<compile_context>
chip_gen: v7x
topology: tpu7x:2x2x1
jax: 0.10.0
libtpu: 0.0.40
codegen_flags: <defaults>
</compile_context>

<pallas_src>
import functools

import jax
import jax.numpy as jnp
import numpy as np
from jax.experimental import pallas as pl
from jax.experimental.pallas import tpu as pltpu

KSIZE = 7
PAD = KSIZE // 2
GAP = 2 * PAD          # zero gap between the fused H / W segments (>= PAD needed)
GROUPS = 16
EPS = 1e-5

# Trace-time hardware query at module scope (never under jit tracing).
try:
    _VMEM_PHYS = int(pltpu.get_tpu_info().vmem_capacity_bytes)
except Exception:                      # emulator / older jax -> conservative (v7x)
    _VMEM_PHYS = 64 * 2**20


def _round_up(v, m):
    return (v + m - 1) // m * m


def _ela_kernel(x_ref, p_ref, pool_ref, seg_ref, sel_ref, rep_ref, mg_ref, mgt_ref,
                o_ref, *, bt, C, HW, HWp, Lc, aligned_taps):
    # Per grid step (everything 2-D and lane-dense):
    #   x_ref    : (bt*C, HW)            input slab (bt samples)
    #   p_ref    : (bt*C, KSIZE+2)       [conv taps | gamma | beta], tiled over bt
    #   pool_ref : (HW, 7*Lc) or (HW, Lc+2*PAD)   pooling (+shift) matrix
    #   seg_ref  : (Lc, 2)               per-segment mean matrix (mask/(cpg*L))
    #   sel_ref  : (4, 2*Lc)             branch-select matrix for mean / inv-std
    #   rep_ref  : (Lc, HWp+HW)          gate broadcast-back matrix
    #   mg_ref   : (G, C)   mgt_ref: (C, G)       group aggregation / broadcast
    x = x_ref[...].astype(jnp.float32)                       # (bt*C, HW)
    params = p_ref[...].astype(jnp.float32)                  # (bt*C, KSIZE+2)

    # 1) fused mean-pool (over W and over H) via MXU, already zero-padded.
    yp = jnp.dot(x, pool_ref[...], preferred_element_type=jnp.float32)

    # 2) depthwise conv1d, both branches at once. On the fast path every slice
    #    start is a multiple of 128 (pre-shifted copies), so no lane rotates.
    conv = params[:, 0:1] * yp[:, 0:Lc]
    for k in range(1, KSIZE):
        sl = yp[:, k * Lc:k * Lc + Lc] if aligned_taps else yp[:, k:k + Lc]
        conv = conv + params[:, k:k + 1] * sl                # (bt*C, Lc)

    # 3) GroupNorm(16, C) statistics, per branch, per sample.
    #    seg folds the 1/(cpg*L) factor -> these are mean contributions.
    ch_m = jnp.dot(conv, seg_ref[...], preferred_element_type=jnp.float32)          # (bt*C, 2)
    ch_m2 = jnp.dot(conv * conv, seg_ref[...], preferred_element_type=jnp.float32)  # (bt*C, 2)
    ch_stats = jnp.concatenate([ch_m, ch_m2], axis=1)                               # (bt*C, 4)

    c_parts = []
    for s in range(bt):                  # static unroll, sublane-aligned slices
        g_s = jnp.dot(mg_ref[...], ch_stats[s * C:(s + 1) * C, :],
                      preferred_element_type=jnp.float32)                           # (G, 4)
        g_mean = g_s[:, 0:2]
        g_var = jnp.maximum(g_s[:, 2:4] - g_mean * g_mean, 0.0)   # clamp 1-pass var
        g_out = jnp.concatenate([g_mean, jax.lax.rsqrt(g_var + EPS)], axis=1)       # (G, 4)
        c_parts.append(jnp.dot(mgt_ref[...], g_out,
                               preferred_element_type=jnp.float32))                 # (C, 4)
    c_out = c_parts[0] if bt == 1 else jnp.concatenate(c_parts, axis=0)             # (bt*C, 4)

    # 4) broadcast the per-branch statistics over the fused sequence with one
    #    tiny constant matmul (keeps the select off the VPU), then GN affine
    #    + sigmoid. Gap/tail columns carry junk but are zeroed by rep below.
    mi = jnp.dot(c_out, sel_ref[...], preferred_element_type=jnp.float32)           # (bt*C, 2*Lc)
    gamma = params[:, KSIZE:KSIZE + 1]
    beta = params[:, KSIZE + 1:KSIZE + 2]
    att = jax.nn.sigmoid((conv - mi[:, 0:Lc]) * (mi[:, Lc:2 * Lc] * gamma) + beta)  # (bt*C, Lc)

    # 5) broadcast both gates back onto the lane-dense slab and apply.
    bc = jnp.dot(att, rep_ref[...], preferred_element_type=jnp.float32)             # (bt*C, HWp+HW)
    o_ref[...] = (x * bc[:, 0:HW] * bc[:, HWp:HWp + HW]).astype(o_ref.dtype)


@functools.partial(jax.jit, static_argnames=("block_batch",))
def ela_pallas(x, conv_w, gamma, beta, block_batch=None):
    B, C, H, W = x.shape
    assert C % GROUPS == 0, "GroupNorm(16, C) requires C % 16 == 0"
    cpg = C // GROUPS
    HW = H * W
    HWp = _round_up(HW, 128)                 # aligned start of the W-gate slab
    Lc = _round_up(H + GAP + W, 128)         # lane-aligned fused conv-output width
    itemsize = x.dtype.itemsize

    # ---- samples per grid step: a divisor of B (no pad) filling the per-chip
    #      DMA-block target (2 MiB on 64-MiB-VMEM chips, 4 MiB otherwise). ----
    target = 4 * 2**20 if _VMEM_PHYS >= 96 * 2**20 else 2 * 2**20
    sample_bytes = C * HW * itemsize
    if block_batch is None:
        bt = 1
        for d in range(1, min(B, 32) + 1):
            if B % d == 0 and d * sample_bytes <= target:
                bt = d
    else:
        bt = int(block_batch)
        assert B % bt == 0, "block_batch must divide the batch size"
    grid = B // bt

    # Lane-aligned pre-shifted conv taps unless the widened pool matrix would
    # be too big for VMEM (large feature maps) -> compact pool fallback.
    aligned_taps = HW * (KSIZE * Lc) * 4 <= 2 * 2**20
    pool_cols = KSIZE * Lc if aligned_taps else Lc + 2 * PAD

    # ---- host-side constant matrices (trace-time numpy -> embedded consts) --
    f32 = np.float32
    pool = np.zeros((HW, pool_cols), f32)
    if aligned_taps:
        for k in range(KSIZE):                         # shifted copy k at col k*Lc
            for h in range(H):
                j = PAD + h - k
                if 0 <= j < Lc:
                    pool[h * W:(h + 1) * W, k * Lc + j] = 1.0 / W
            for w in range(W):
                j = PAD + H + GAP + w - k
                if 0 <= j < Lc:
                    pool[w::W, k * Lc + j] = 1.0 / H
    else:
        for h in range(H):
            pool[h * W:(h + 1) * W, PAD + h] = 1.0 / W
        for w in range(W):
            pool[w::W, PAD + H + GAP + w] = 1.0 / H

    seg = np.zeros((Lc, 2), f32)                       # masked group-mean matrices
    seg[0:H, 0] = 1.0 / (cpg * H)
    seg[H + GAP:H + GAP + W, 1] = 1.0 / (cpg * W)

    sel = np.zeros((4, 2 * Lc), f32)                   # branch-select for mean / inv
    sel[0, 0:H] = 1.0
    sel[1, H + GAP:H + GAP + W] = 1.0
    sel[2, Lc:Lc + H] = 1.0
    sel[3, Lc + H + GAP:Lc + H + GAP + W] = 1.0

    rep = np.zeros((Lc, HWp + HW), f32)                # gate broadcast-back
    for h in range(H):
        rep[h, h * W:(h + 1) * W] = 1.0                # a_h over all w
    for w in range(W):
        rep[H + GAP + w, HWp + w:HWp + HW:W] = 1.0     # a_w over all h (aligned base)

    mg = (np.arange(C)[None, :] // cpg ==
          np.arange(GROUPS)[:, None]).astype(f32)      # (G, C) per-sample aggregation
    mgt = np.ascontiguousarray(mg.T)                   # (C, G) broadcast back

    # ---- runtime parameters: [taps | gamma | beta] tiled over bt -------------
    p_chan = jnp.concatenate(
        [conv_w.reshape(C, KSIZE).astype(jnp.float32),
         gamma.reshape(C, 1).astype(jnp.float32),
         beta.reshape(C, 1).astype(jnp.float32)], axis=1)          # (C, KSIZE+2)
    params = jnp.tile(p_chan, (bt, 1))                             # (bt*C, KSIZE+2)

    # ---- lane-dense input slab (no batch padding: bt divides B) --------------
    x2d = x.reshape(B * C, HW)

    # ---- VMEM budget (per-chip physical cap; block + consts double-buffered) -
    const_bytes = 4 * (HW * pool_cols + Lc * 2 + 4 * 2 * Lc + Lc * (HWp + HW)
                       + 2 * GROUPS * C + bt * C * (KSIZE + 2))
    block_bytes = bt * C * HW * itemsize
    inter_bytes = 4 * bt * C * (HW + pool_cols + 3 * Lc + HWp + HW)
    need = 4 * block_bytes + 2 * const_bytes + inter_bytes + (8 << 20)
    vmem_limit = int(min(max(32 * 2**20, _VMEM_PHYS * 3 // 4),
                         max(32 * 2**20, need)))

    cost = pl.CostEstimate(
        flops=int(B * C * (2 * HW * pool_cols + 2 * KSIZE * Lc + 2 * 2 * 2 * Lc
                           + 2 * 4 * 2 * Lc + 2 * Lc * (HWp + HW) + 3 * HW)
                  + B * 2 * 2 * GROUPS * C * 4),
        transcendentals=int(B * C * Lc),
        bytes_accessed=int(2 * B * C * HW * itemsize + grid * const_bytes))

    kernel = functools.partial(_ela_kernel, bt=bt, C=C, HW=HW, HWp=HWp, Lc=Lc,
                               aligned_taps=aligned_taps)
    out2d = pl.pallas_call(
        kernel,
        out_shape=jax.ShapeDtypeStruct((B * C, HW), x.dtype),
        grid=(grid,),
        in_specs=[
            pl.BlockSpec((bt * C, HW), lambda i: (i, 0)),           # x slab
            pl.BlockSpec((bt * C, KSIZE + 2), lambda i: (0, 0)),    # taps/gamma/beta
            pl.BlockSpec((HW, pool_cols), lambda i: (0, 0)),        # pooling (+shift) matrix
            pl.BlockSpec((Lc, 2), lambda i: (0, 0)),                # segment-mean matrix
            pl.BlockSpec((4, 2 * Lc), lambda i: (0, 0)),            # branch-select matrix
            pl.BlockSpec((Lc, HWp + HW), lambda i: (0, 0)),         # broadcast-back matrix
            pl.BlockSpec((GROUPS, C), lambda i: (0, 0)),            # group aggregation
            pl.BlockSpec((C, GROUPS), lambda i: (0, 0)),            # group broadcast
        ],
        out_specs=pl.BlockSpec((bt * C, HW), lambda i: (i, 0)),
        compiler_params=pltpu.CompilerParams(
            dimension_semantics=("parallel",),
            vmem_limit_bytes=vmem_limit),
        cost_estimate=cost,
    )(x2d, params, jnp.asarray(pool), jnp.asarray(seg), jnp.asarray(sel),
      jnp.asarray(rep), jnp.asarray(mg), jnp.asarray(mgt))

    return out2d.reshape(B, C, H, W)


def ela_reference(x, conv_w, gamma, beta):
    """Pure-JAX reference mirroring the PyTorch forward."""
    B, C, H, W = x.shape
    wc = conv_w.reshape(C, KSIZE)

    def branch(y):  # y: (B, C, L)
        L = y.shape[2]
        yp = jnp.pad(y, ((0, 0), (0, 0), (PAD, PAD)))
        conv = jnp.zeros_like(y)
        for k in range(KSIZE):
            conv = conv + wc[None, :, k:k + 1] * yp[:, :, k:k + L]
        g = conv.reshape(B, GROUPS, (C // GROUPS) * L)
        mean = g.mean(axis=2, keepdims=True)
        var = g.var(axis=2, keepdims=True)
        norm = (g - mean) / jnp.sqrt(var + EPS)
        norm = norm.reshape(B, C, L) * gamma[None, :, None] + beta[None, :, None]
        return jax.nn.sigmoid(norm)

    a_h = branch(x.mean(axis=3))       # (B, C, H)
    a_w = branch(x.mean(axis=2))       # (B, C, W)
    return x * a_h[:, :, :, None] * a_w[:, :, None, :]


if __name__ == "__main__":
    key = jax.random.PRNGKey(0)
    k_x, k_w, k_g, k_b = jax.random.split(key, 4)

    B, C, H, W = 2, 32, 16, 16   # C must be divisible by GroupNorm's 16 groups
    x = jax.random.normal(k_x, (B, C, H, W), dtype=jnp.float32)
    # Deterministic synthetic params (Conv1d depthwise weight (C,1,K); GN affine (C,))
    conv_w = 0.1 * jax.random.normal(k_w, (C, 1, KSIZE), dtype=jnp.float32)
    gamma = 1.0 + 0.1 * jax.random.normal(k_g, (C,), dtype=jnp.float32)
    beta = 0.1 * jax.random.normal(k_b, (C,), dtype=jnp.float32)

    out = ela_pallas(x, conv_w, gamma, beta)
    out = jax.block_until_ready(out)

    ref = ela_reference(x, conv_w, gamma, beta)
    assert out.shape == (B, C, H, W)
    max_err = float(jnp.max(jnp.abs(out - ref)))
    assert jnp.allclose(out, ref, atol=1e-4, rtol=1e-4), \
        f"mismatch vs reference (max abs err {max_err})"

    print("KERNEL_OK")
</pallas_src>

<mosaic_0001>
module attributes {stable_mosaic.version = 11 : i64} {
  func.func @_ela_kernel(%arg0: i32, %arg1: memref<64x256xf32, #tpu.memory_space<vmem>>, %arg2: memref<64x9xf32, #tpu.memory_space<vmem>>, %arg3: memref<256x896xf32, #tpu.memory_space<vmem>>, %arg4: memref<128x2xf32, #tpu.memory_space<vmem>>, %arg5: memref<4x256xf32, #tpu.memory_space<vmem>>, %arg6: memref<128x512xf32, #tpu.memory_space<vmem>>, %arg7: memref<16x32xf32, #tpu.memory_space<vmem>>, %arg8: memref<32x16xf32, #tpu.memory_space<vmem>>, %arg9: memref<64x256xf32, #tpu.memory_space<vmem>>) attributes {dimension_semantics = [#tpu.dimension_semantics<parallel>], iteration_bounds = array<i64: 1>, scalar_prefetch = 0 : i64, scratch_operands = 0 : i64, tpu.core_type = #tpu.core_type<tc>, window_params = [{transform_indices = @transform_0, window_bounds = array<i64: 64, 256>}, {pipeline_mode = #tpu.pipeline_mode<synchronous>, transform_indices = @transform_1, window_bounds = array<i64: 64, 9>}, {pipeline_mode = #tpu.pipeline_mode<synchronous>, transform_indices = @transform_2, window_bounds = array<i64: 256, 896>}, {pipeline_mode = #tpu.pipeline_mode<synchronous>, transform_indices = @transform_3, window_bounds = array<i64: 128, 2>}, {pipeline_mode = #tpu.pipeline_mode<synchronous>, transform_indices = @transform_4, window_bounds = array<i64: 4, 256>}, {pipeline_mode = #tpu.pipeline_mode<synchronous>, transform_indices = @transform_5, window_bounds = array<i64: 128, 512>}, {pipeline_mode = #tpu.pipeline_mode<synchronous>, transform_indices = @transform_6, window_bounds = array<i64: 16, 32>}, {pipeline_mode = #tpu.pipeline_mode<synchronous>, transform_indices = @transform_7, window_bounds = array<i64: 32, 16>}, {transform_indices = @transform_8, window_bounds = array<i64: 64, 256>}]} {
    %c0 = arith.constant 0 : index
    %c0_0 = arith.constant 0 : index
    %0 = vector.load %arg1[%c0, %c0_0] : memref<64x256xf32, #tpu.memory_space<vmem>>, vector<64x256xf32>
    %c0_1 = arith.constant 0 : index
    %c0_2 = arith.constant 0 : index
    %1 = vector.load %arg2[%c0_1, %c0_2] : memref<64x9xf32, #tpu.memory_space<vmem>>, vector<64x9xf32>
    %c0_3 = arith.constant 0 : index
    %c0_4 = arith.constant 0 : index
    %2 = vector.load %arg3[%c0_3, %c0_4] : memref<256x896xf32, #tpu.memory_space<vmem>>, vector<256x896xf32>
    %cst = arith.constant dense<0.000000e+00> : vector<64x896xf32>
    %3 = tpu.matmul %0, %2, %cst {dimension_numbers = #tpu.dot_dimension_numbers<[1], [0], [0], [1], [0, 0, 1, 1], [], []>} : vector<64x256xf32>, vector<256x896xf32>, vector<64x896xf32> -> vector<64x896xf32>
    %4 = vector.extract_strided_slice %1 {offsets = [0, 0], sizes = [64, 1], strides = [1, 1]} : vector<64x9xf32> to vector<64x1xf32>
    %5 = vector.extract_strided_slice %3 {offsets = [0, 0], sizes = [64, 128], strides = [1, 1]} : vector<64x896xf32> to vector<64x128xf32>
    %6 = vector.broadcast %4 : vector<64x1xf32> to vector<64x128xf32>
    %7 = arith.mulf %6, %5 : vector<64x128xf32>
    %8 = vector.extract_strided_slice %3 {offsets = [0, 128], sizes = [64, 128], strides = [1, 1]} : vector<64x896xf32> to vector<64x128xf32>
    %9 = vector.extract_strided_slice %1 {offsets = [0, 1], sizes = [64, 1], strides = [1, 1]} : vector<64x9xf32> to vector<64x1xf32>
    %10 = vector.broadcast %9 : vector<64x1xf32> to vector<64x128xf32>
    %11 = arith.mulf %10, %8 : vector<64x128xf32>
    %12 = arith.addf %7, %11 : vector<64x128xf32>
    %13 = vector.extract_strided_slice %3 {offsets = [0, 256], sizes = [64, 128], strides = [1, 1]} : vector<64x896xf32> to vector<64x128xf32>
    %14 = vector.extract_strided_slice %1 {offsets = [0, 2], sizes = [64, 1], strides = [1, 1]} : vector<64x9xf32> to vector<64x1xf32>
    %15 = vector.broadcast %14 : vector<64x1xf32> to vector<64x128xf32>
    %16 = arith.mulf %15, %13 : vector<64x128xf32>
    %17 = arith.addf %12, %16 : vector<64x128xf32>
    %18 = vector.extract_strided_slice %3 {offsets = [0, 384], sizes = [64, 128], strides = [1, 1]} : vector<64x896xf32> to vector<64x128xf32>
    %19 = vector.extract_strided_slice %1 {offsets = [0, 3], sizes = [64, 1], strides = [1, 1]} : vector<64x9xf32> to vector<64x1xf32>
    %20 = vector.broadcast %19 : vector<64x1xf32> to vector<64x128xf32>
    %21 = arith.mulf %20, %18 : vector<64x128xf32>
    %22 = arith.addf %17, %21 : vector<64x128xf32>
    %23 = vector.extract_strided_slice %3 {offsets = [0, 512], sizes = [64, 128], strides = [1, 1]} : vector<64x896xf32> to vector<64x128xf32>
    %24 = vector.extract_strided_slice %1 {offsets = [0, 4], sizes = [64, 1], strides = [1, 1]} : vector<64x9xf32> to vector<64x1xf32>
    %25 = vector.broadcast %24 : vector<64x1xf32> to vector<64x128xf32>
    %26 = arith.mulf %25, %23 : vector<64x128xf32>
    %27 = arith.addf %22, %26 : vector<64x128xf32>
    %28 = vector.extract_strided_slice %3 {offsets = [0, 640], sizes = [64, 128], strides = [1, 1]} : vector<64x896xf32> to vector<64x128xf32>
    %29 = vector.extract_strided_slice %1 {offsets = [0, 5], sizes = [64, 1], strides = [1, 1]} : vector<64x9xf32> to vector<64x1xf32>
    %30 = vector.broadcast %29 : vector<64x1xf32> to vector<64x128xf32>
    %31 = arith.mulf %30, %28 : vector<64x128xf32>
    %32 = arith.addf %27, %31 : vector<64x128xf32>
    %33 = vector.extract_strided_slice %3 {offsets = [0, 768], sizes = [64, 128], strides = [1, 1]} : vector<64x896xf32> to vector<64x128xf32>
    %34 = vector.extract_strided_slice %1 {offsets = [0, 6], sizes = [64, 1], strides = [1, 1]} : vector<64x9xf32> to vector<64x1xf32>
    %35 = vector.broadcast %34 : vector<64x1xf32> to vector<64x128xf32>
    %36 = arith.mulf %35, %33 : vector<64x128xf32>
    %37 = arith.addf %32, %36 : vector<64x128xf32>
    %c0_5 = arith.constant 0 : index
    %c0_6 = arith.constant 0 : index
    %38 = vector.load %arg4[%c0_5, %c0_6] : memref<128x2xf32, #tpu.memory_space<vmem>>, vector<128x2xf32>
    %cst_7 = arith.constant dense<0.000000e+00> : vector<64x2xf32>
    %39 = tpu.matmul %37, %38, %cst_7 {dimension_numbers = #tpu.dot_dimension_numbers<[1], [0], [0], [1], [0, 0, 1, 1], [], []>} : vector<64x128xf32>, vector<128x2xf32>, vector<64x2xf32> -> vector<64x2xf32>
    %40 = arith.mulf %37, %37 : vector<64x128xf32>
    %c0_8 = arith.constant 0 : index
    %c0_9 = arith.constant 0 : index
    %41 = vector.load %arg4[%c0_8, %c0_9] : memref<128x2xf32, #tpu.memory_space<vmem>>, vector<128x2xf32>
    %cst_10 = arith.constant dense<0.000000e+00> : vector<64x2xf32>
    %42 = tpu.matmul %40, %41, %cst_10 {dimension_numbers = #tpu.dot_dimension_numbers<[1], [0], [0], [1], [0, 0, 1, 1], [], []>} : vector<64x128xf32>, vector<128x2xf32>, vector<64x2xf32> -> vector<64x2xf32>
    %43 = tpu.concatenate %39, %42 in 1 : vector<64x2xf32>, vector<64x2xf32> -> vector<64x4xf32>
    %c0_11 = arith.constant 0 : index
    %c0_12 = arith.constant 0 : index
    %44 = vector.load %arg7[%c0_11, %c0_12] : memref<16x32xf32, #tpu.memory_space<vmem>>, vector<16x32xf32>
    %45 = vector.extract_strided_slice %43 {offsets = [0, 0], sizes = [32, 4], strides = [1, 1]} : vector<64x4xf32> to vector<32x4xf32>
    %cst_13 = arith.constant dense<0.000000e+00> : vector<16x4xf32>
    %46 = tpu.matmul %44, %45, %cst_13 {dimension_numbers = #tpu.dot_dimension_numbers<[1], [0], [0], [1], [0, 0, 1, 1], [], []>} : vector<16x32xf32>, vector<32x4xf32>, vector<16x4xf32> -> vector<16x4xf32>
    %47 = vector.extract_strided_slice %46 {offsets = [0, 0], sizes = [16, 2], strides = [1, 1]} : vector<16x4xf32> to vector<16x2xf32>
    %48 = vector.extract_strided_slice %46 {offsets = [0, 2], sizes = [16, 2], strides = [1, 1]} : vector<16x4xf32> to vector<16x2xf32>
    %49 = arith.mulf %47, %47 : vector<16x2xf32>
    %50 = arith.subf %48, %49 : vector<16x2xf32>
    %cst_14 = arith.constant 0.000000e+00 : f32
    %51 = vector.broadcast %cst_14 : f32 to vector<16x2xf32>
    %52 = arith.maximumf %50, %51 : vector<16x2xf32>
    %cst_15 = arith.constant 9.99999974E-6 : f32
    %53 = vector.broadcast %cst_15 : f32 to vector<16x2xf32>
    %54 = arith.addf %52, %53 : vector<16x2xf32>
    %55 = math.rsqrt %54 : vector<16x2xf32>
    %56 = tpu.concatenate %47, %55 in 1 : vector<16x2xf32>, vector<16x2xf32> -> vector<16x4xf32>
    %c0_16 = arith.constant 0 : index
    %c0_17 = arith.constant 0 : index
    %57 = vector.load %arg8[%c0_16, %c0_17] : memref<32x16xf32, #tpu.memory_space<vmem>>, vector<32x16xf32>
    %cst_18 = arith.constant dense<0.000000e+00> : vector<32x4xf32>
    %58 = tpu.matmul %57, %56, %cst_18 {dimension_numbers = #tpu.dot_dimension_numbers<[1], [0], [0], [1], [0, 0, 1, 1], [], []>} : vector<32x16xf32>, vector<16x4xf32>, vector<32x4xf32> -> vector<32x4xf32>
    %c0_19 = arith.constant 0 : index
    %c0_20 = arith.constant 0 : index
    %59 = vector.load %arg7[%c0_19, %c0_20] : memref<16x32xf32, #tpu.memory_space<vmem>>, vector<16x32xf32>
    %60 = vector.extract_strided_slice %43 {offsets = [32, 0], sizes = [32, 4], strides = [1, 1]} : vector<64x4xf32> to vector<32x4xf32>
    %cst_21 = arith.constant dense<0.000000e+00> : vector<16x4xf32>
    %61 = tpu.matmul %59, %60, %cst_21 {dimension_numbers = #tpu.dot_dimension_numbers<[1], [0], [0], [1], [0, 0, 1, 1], [], []>} : vector<16x32xf32>, vector<32x4xf32>, vector<16x4xf32> -> vector<16x4xf32>
    %62 = vector.extract_strided_slice %61 {offsets = [0, 0], sizes = [16, 2], strides = [1, 1]} : vector<16x4xf32> to vector<16x2xf32>
    %63 = vector.extract_strided_slice %61 {offsets = [0, 2], sizes = [16, 2], strides = [1, 1]} : vector<16x4xf32> to vector<16x2xf32>
    %64 = arith.mulf %62, %62 : vector<16x2xf32>
    %65 = arith.subf %63, %64 : vector<16x2xf32>
    %cst_22 = arith.constant 0.000000e+00 : f32
    %66 = vector.broadcast %cst_22 : f32 to vector<16x2xf32>
    %67 = arith.maximumf %65, %66 : vector<16x2xf32>
    %cst_23 = arith.constant 9.99999974E-6 : f32
    %68 = vector.broadcast %cst_23 : f32 to vector<16x2xf32>
    %69 = arith.addf %67, %68 : vector<16x2xf32>
    %70 = math.rsqrt %69 : vector<16x2xf32>
    %71 = tpu.concatenate %62, %70 in 1 : vector<16x2xf32>, vector<16x2xf32> -> vector<16x4xf32>
    %c0_24 = arith.constant 0 : index
    %c0_25 = arith.constant 0 : index
    %72 = vector.load %arg8[%c0_24, %c0_25] : memref<32x16xf32, #tpu.memory_space<vmem>>, vector<32x16xf32>
    %cst_26 = arith.constant dense<0.000000e+00> : vector<32x4xf32>
    %73 = tpu.matmul %72, %71, %cst_26 {dimension_numbers = #tpu.dot_dimension_numbers<[1], [0], [0], [1], [0, 0, 1, 1], [], []>} : vector<32x16xf32>, vector<16x4xf32>, vector<32x4xf32> -> vector<32x4xf32>
    %74 = tpu.concatenate %58, %73 in 0 : vector<32x4xf32>, vector<32x4xf32> -> vector<64x4xf32>
    %c0_27 = arith.constant 0 : index
    %c0_28 = arith.constant 0 : index
    %75 = vector.load %arg5[%c0_27, %c0_28] : memref<4x256xf32, #tpu.memory_space<vmem>>, vector<4x256xf32>
    %cst_29 = arith.constant dense<0.000000e+00> : vector<64x256xf32>
    %76 = tpu.matmul %74, %75, %cst_29 {dimension_numbers = #tpu.dot_dimension_numbers<[1], [0], [0], [1], [0, 0, 1, 1], [], []>} : vector<64x4xf32>, vector<4x256xf32>, vector<64x256xf32> -> vector<64x256xf32>
    %77 = vector.extract_strided_slice %1 {offsets = [0, 7], sizes = [64, 1], strides = [1, 1]} : vector<64x9xf32> to vector<64x1xf32>
    %78 = vector.extract_strided_slice %1 {offsets = [0, 8], sizes = [64, 1], strides = [1, 1]} : vector<64x9xf32> to vector<64x1xf32>
    %79 = vector.extract_strided_slice %76 {offsets = [0, 0], sizes = [64, 128], strides = [1, 1]} : vector<64x256xf32> to vector<64x128xf32>
    %80 = arith.subf %37, %79 : vector<64x128xf32>
    %81 = vector.extract_strided_slice %76 {offsets = [0, 128], sizes = [64, 128], strides = [1, 1]} : vector<64x256xf32> to vector<64x128xf32>
    %82 = vector.broadcast %77 : vector<64x1xf32> to vector<64x128xf32>
    %83 = arith.mulf %81, %82 : vector<64x128xf32>
    %84 = arith.mulf %80, %83 : vector<64x128xf32>
    %85 = vector.broadcast %78 : vector<64x1xf32> to vector<64x128xf32>
    %86 = arith.addf %84, %85 : vector<64x128xf32>
    %87 = arith.negf %86 : vector<64x128xf32>
    %88 = math.exp %87 : vector<64x128xf32>
    %cst_30 = arith.constant 1.000000e+00 : f32
    %89 = vector.broadcast %cst_30 : f32 to vector<64x128xf32>
    %90 = arith.addf %89, %88 : vector<64x128xf32>
    %91 = arith.divf %89, %90 : vector<64x128xf32>
    %c0_31 = arith.constant 0 : index
    %c0_32 = arith.constant 0 : index
    %92 = vector.load %arg6[%c0_31, %c0_32] : memref<128x512xf32, #tpu.memory_space<vmem>>, vector<128x512xf32>
    %cst_33 = arith.constant dense<0.000000e+00> : vector<64x512xf32>
    %93 = tpu.matmul %91, %92, %cst_33 {dimension_numbers = #tpu.dot_dimension_numbers<[1], [0], [0], [1], [0, 0, 1, 1], [], []>} : vector<64x128xf32>, vector<128x512xf32>, vector<64x512xf32> -> vector<64x512xf32>
    %94 = vector.extract_strided_slice %93 {offsets = [0, 0], sizes = [64, 256], strides = [1, 1]} : vector<64x512xf32> to vector<64x256xf32>
    %95 = arith.mulf %0, %94 : vector<64x256xf32>
    %96 = vector.extract_strided_slice %93 {offsets = [0, 256], sizes = [64, 256], strides = [1, 1]} : vector<64x512xf32> to vector<64x256xf32>
    %97 = arith.mulf %95, %96 : vector<64x256xf32>
    %c0_34 = arith.constant 0 : index
    %c0_35 = arith.constant 0 : index
    %98 = vector.load %arg9[%c0_34, %c0_35] : memref<64x256xf32, #tpu.memory_space<vmem>>, vector<64x256xf32>
    tpu.vector_store %arg9[%c0_34, %c0_35], %97 {strides = array<i32>} : memref<64x256xf32, #tpu.memory_space<vmem>>, vector<64x256xf32>,
    return
  }
  func.func @transform_0(%arg0: i32) -> (i32, i32) {
    %c0_i32 = arith.constant 0 : i32
    %c0_i32_0 = arith.constant 0 : i32
    return %arg0, %c0_i32 : i32, i32
  }
  func.func @transform_1(%arg0: i32) -> (i32, i32) {
    %c0_i32 = arith.constant 0 : i32
    %c0_i32_0 = arith.constant 0 : i32
    %c0_i32_1 = arith.constant 0 : i32
    return %c0_i32, %c0_i32_0 : i32, i32
  }
  func.func @transform_2(%arg0: i32) -> (i32, i32) {
    %c0_i32 = arith.constant 0 : i32
    %c0_i32_0 = arith.constant 0 : i32
    %c0_i32_1 = arith.constant 0 : i32
    return %c0_i32, %c0_i32_0 : i32, i32
  }
  func.func @transform_3(%arg0: i32) -> (i32, i32) {
    %c0_i32 = arith.constant 0 : i32
    %c0_i32_0 = arith.constant 0 : i32
    %c0_i32_1 = arith.constant 0 : i32
    return %c0_i32, %c0_i32_0 : i32, i32
  }
  func.func @transform_4(%arg0: i32) -> (i32, i32) {
    %c0_i32 = arith.constant 0 : i32
    %c0_i32_0 = arith.constant 0 : i32
    %c0_i32_1 = arith.constant 0 : i32
    return %c0_i32, %c0_i32_0 : i32, i32
  }
  func.func @transform_5(%arg0: i32) -> (i32, i32) {
    %c0_i32 = arith.constant 0 : i32
    %c0_i32_0 = arith.constant 0 : i32
    %c0_i32_1 = arith.constant 0 : i32
    return %c0_i32, %c0_i32_0 : i32, i32
  }
  func.func @transform_6(%arg0: i32) -> (i32, i32) {
    %c0_i32 = arith.constant 0 : i32
    %c0_i32_0 = arith.constant 0 : i32
    %c0_i32_1 = arith.constant 0 : i32
    return %c0_i32, %c0_i32_0 : i32, i32
  }
  func.func @transform_7(%arg0: i32) -> (i32, i32) {
    %c0_i32 = arith.constant 0 : i32
    %c0_i32_0 = arith.constant 0 : i32
    %c0_i32_1 = arith.constant 0 : i32
    return %c0_i32, %c0_i32_0 : i32, i32
  }
  func.func @transform_8(%arg0: i32) -> (i32, i32) {
    %c0_i32 = arith.constant 0 : i32
    %c0_i32_0 = arith.constant 0 : i32
    return %arg0, %c0_i32 : i32, i32
  }
}

</mosaic_0001>

<bundles_post_ra>
// kernel: ela_pallas.1
= control target key start
LH: loop header
LB: loop body
LE: loop exit
PB: predicated region body
PF: predicated region fallthrough
CT: control target
= control target key end

     0   :  { %13 = vsyncpa [#allocation3], 0  ;;  %s3210_s27 = smov [#allocation2]   ;;  %s4895_s0 = inlined_call_operand.vmem [shape: f32[64,256], index: 0, kind: input, shape index: {}]   ;;  %s4896_s1 = inlined_call_operand.vmem [shape: f32[64,9], index: 1, kind: input, shape index: {}]   ;;  %s4897_s2 = inlined_call_operand.vmem [shape: f32[256,896], index: 2, kind: input, shape index: {}]   ;;  %s4898_s3 = inlined_call_operand.hbm [shape: f32[128,2], index: 3, kind: input, shape index: {}]   ;;  %s4899_s4 = inlined_call_operand.vmem [shape: f32[4,256], index: 4, kind: input, shape index: {}]   ;;  %s4900_s5 = inlined_call_operand.vmem [shape: f32[128,512], index: 5, kind: input, shape index: {}]   ;;  %s4901_s6 = inlined_call_operand.vmem [shape: f32[16,32], index: 6, kind: input, shape index: {}]   ;;  %s4902_s7 = inlined_call_operand.vmem [shape: f32[32,16], index: 7, kind: input, shape index: {}]   ;;  %s4903_s8 = inlined_call_operand.vmem [shape: f32[64,256], index: 8, kind: output, shape index: {}]  }
   0x1   :  { %s25_s28 = sshll.u32 %s3210_s27, 4  ;;  %s3186_s9 = scalar_lea.hbm %s4898_s3, 2048  ;;  %s26_s28 = int_to_ptr.vmem [resolvable:$true] %s25_s28 }
   0x2   :  { %p3187_p0 = scmp.ne.s32.totalorder %s4898_s3, %s3186_s9  ;;  %p3190_p1 = scmp.lt.u32.totalorder %s3186_s9, %s4898_s3 }
   0x4   :  { %p3192_p2 = pnand %p3190_p1, %p3187_p0 }
   0x6   :  { %3195 = shalt.err (!%p3192_p2)
}
   0x7   :  { %s3196_s14 = scalar_lea.vmem %s26_s28, 2048  ;;  %p3201_p4 = scmp.lt.s32.totalorder %s26_s28, %s26_s28 }
   0x8   :  { %p3197_p3 = scmp.ne.s32.totalorder %s26_s28, %s3196_s14  ;;  %p3202_p5 = scmp.lt.s32.totalorder %s3196_s14, %s3196_s14 }
   0xa   :  { %p3203_p6 = por %p3202_p5, %p3201_p4 }
   0xc   :  { %p3204_p7 = pnand %p3203_p6, %p3197_p3 }
   0xe   :  { %3207 = shalt.err (!%p3204_p7)
}
   0xf   :  { %s3211_s15 = smov 128   ;;  %s3212_s16 = smov 8  }
  0x10   :  { %31 = dma.hbm_to_vmem [thread:$0]  %s4898_s3, 2048, %s26_s28, [#allocation3], %s3211_s15, %s3211_s15, %s3212_s16  }
  0x11   :  { %3208 = dma.done.wait [#allocation3], 2048  }
  0x12   :  { %3209 = vsyncadd [#allocation3], 4294965248  ;;  %v3213_v0 = vmov 0   ;;  %v68_v1 = vld [vmem:[%s4897_s2 + $0x8] sm:$0xff]  ;;  %v75_v2 = vld [vmem:[%s4897_s2 + $0x40] sm:$0xff]  ;;  %s3220_s30 = smov 2  }
  0x13   :  { %3061 = vset.pattern.permute.xlu1 %v3213_v0  ;;  %3059 = vset.pattern.permute.xlu0 %v3213_v0  ;;  %v67_v3 = vld [vmem:[%s4897_s2] sm:$0xff]  ;;  %v2653_v4 = vpack.c.bf16 %v75_v2, %v68_v1  ;;  %v74_v5 = vld [vmem:[%s4897_s2 + $0x38] sm:$0xff]  ;;  %v77_v7 = vld [vmem:[%s4897_s2 + $0x50] sm:$0xff]  ;;  %vm1348_vm0 = vcmask 261120   ;;  %vm1337_vm1 = vcmask 15360   ;;  %vm1454_vm2 = vcmask 130048  }
  0x14   :  { %v70_v6 = vld [vmem:[%s4897_s2 + $0x18] sm:$0xff]  ;;  %v2655_v8 = vpack.c.bf16 %v74_v5, %v67_v3  ;;  %v89_v11 = vld [vmem:[%s4897_s2 + $0xb0] sm:$0xff]  ;;  %v76_v14 = vld [vmem:[%s4897_s2 + $0x48] sm:$0xff]  ;;  %vm1760_vm3 = vcmask 1043456   ;;  %vm1735_vm4 = vcmask 31744  }
  0x15   :  { %v2717_v9 = vpack.c.bf16 %v77_v7, %v70_v6  ;;  %v82_v10 = vld [vmem:[%s4897_s2 + $0x78] sm:$0xff]  ;;  %v69_v12 = vld [vmem:[%s4897_s2 + $0x10] sm:$0xff]  ;;  %2654 = vmatprep.subr.bf16.mxu0 %v2653_v4  ;;  %v88_v16 = vld [vmem:[%s4897_s2 + $0xa8] sm:$0xff] }
  0x16   :  { %v2657_v13 = vpack.c.bf16 %v89_v11, %v82_v10  ;;  %v81_v15 = vld [vmem:[%s4897_s2 + $0x70] sm:$0xff]  ;;  %2656 = vmatpush1.bf16.msra.mxu0 %v2655_v8  ;;  %v2719_v17 = vpack.c.bf16 %v76_v14, %v69_v12  ;;  %v84_v19 = vld [vmem:[%s4897_s2 + $0x88] sm:$0xff]  ;;  %v91_v20 = vld [vmem:[%s4897_s2 + $0xc0] sm:$0xff] }
  0x17   :  { %2718 = vmatprep.subr.bf16.mxu1 %v2717_v9  ;;  %v2659_v18 = vpack.c.bf16 %v88_v16, %v81_v15  ;;  %v96_v21 = vld [vmem:[%s4897_s2 + $0xe8] sm:$0xff]  ;;  %v2721_v22 = vpack.c.bf16 %v91_v20, %v84_v19  ;;  %v103_v23 = vld [vmem:[%s4897_s2 + $0x120] sm:$0xff]  ;;  %v90_v25 = vld [vmem:[%s4897_s2 + $0xb8] sm:$0xff] }
  0x18   :  { %2658 = vmatprep.subr.bf16.mxu0 %v2657_v13  ;;  %v83_v24 = vld [vmem:[%s4897_s2 + $0x80] sm:$0xff]  ;;  %2720 = vmatpush1.bf16.msra.mxu1 %v2719_v17  ;;  %v2661_v26 = vpack.c.bf16 %v103_v23, %v96_v21  ;;  %v102_v29 = vld [vmem:[%s4897_s2 + $0x118] sm:$0xff]  ;;  %v105_v31 = vld [vmem:[%s4897_s2 + $0x130] sm:$0xff] }
  0x19   :  { %v2723_v27 = vpack.c.bf16 %v90_v25, %v83_v24  ;;  %v95_v28 = vld [vmem:[%s4897_s2 + $0xe0] sm:$0xff]  ;;  %v98_v30 = vld [vmem:[%s4897_s2 + $0xf8] sm:$0xff]  ;;  %2722 = vmatprep.subr.bf16.mxu1 %v2721_v22  ;;  %v117_v33 = vld [vmem:[%s4897_s2 + $0x190] sm:$0xff] }
  0x1a   :  { %v110_v32 = vld [vmem:[%s4897_s2 + $0x158] sm:$0xff]  ;;  %2660 = vmatpush1.bf16.msra.mxu0 %v2659_v18  ;;  %v2663_v34 = vpack.c.bf16 %v102_v29, %v95_v28  ;;  %v2725_v35 = vpack.c.bf16 %v105_v31, %v98_v30  ;;  %v97_v36 = vld [vmem:[%s4897_s2 + $0xf0] sm:$0xff]  ;;  %v104_v37 = vld [vmem:[%s4897_s2 + $0x128] sm:$0xff] }
  0x1b   :  { %v109_v38 = vld [vmem:[%s4897_s2 + $0x150] sm:$0xff]  ;;  %2662 = vmatprep.subr.bf16.mxu0 %v2661_v26  ;;  %v2665_v39 = vpack.c.bf16 %v117_v33, %v110_v32  ;;  %v116_v40 = vld [vmem:[%s4897_s2 + $0x188] sm:$0xff]  ;;  %v119_v42 = vld [vmem:[%s4897_s2 + $0x1a0] sm:$0xff]  ;;  %v2727_v43 = vpack.c.bf16 %v104_v37, %v97_v36 }
  0x1c   :  { %v112_v41 = vld [vmem:[%s4897_s2 + $0x168] sm:$0xff]  ;;  %2724 = vmatpush1.bf16.msra.mxu1 %v2723_v27  ;;  %v131_v45 = vld [vmem:[%s4897_s2 + $0x200] sm:$0xff]  ;;  %v118_v48 = vld [vmem:[%s4897_s2 + $0x198] sm:$0xff]  ;;  %v2667_v49 = vpack.c.bf16 %v116_v40, %v109_v38 }
  0x1d   :  { %v124_v44 = vld [vmem:[%s4897_s2 + $0x1c8] sm:$0xff]  ;;  %2726 = vmatprep.subr.bf16.mxu1 %v2725_v35  ;;  %v2729_v46 = vpack.c.bf16 %v119_v42, %v112_v41  ;;  %v111_v47 = vld [vmem:[%s4897_s2 + $0x160] sm:$0xff]  ;;  %v126_v50 = vld [vmem:[%s4897_s2 + $0x1d8] sm:$0xff] }
  0x1e   :  { %2664 = vmatpush1.bf16.msra.mxu0 %v2663_v34  ;;  %v133_v51 = vld [vmem:[%s4897_s2 + $0x210] sm:$0xff]  ;;  %v2669_v52 = vpack.c.bf16 %v131_v45, %v124_v44  ;;  %v123_v53 = vld [vmem:[%s4897_s2 + $0x1c0] sm:$0xff]  ;;  %v130_v54 = vld [vmem:[%s4897_s2 + $0x1f8] sm:$0xff]  ;;  %v2731_v55 = vpack.c.bf16 %v118_v48, %v111_v47 }
  0x1f   :  { %2666 = vmatprep.subr.bf16.mxu0 %v2665_v39  ;;  %v138_v56 = vld [vmem:[%s4897_s2 + $0x238] sm:$0xff]  ;;  %v145_v57 = vld [vmem:[%s4897_s2 + $0x270] sm:$0xff]  ;;  %v2733_v58 = vpack.c.bf16 %v133_v51, %v126_v50  ;;  %v132_v60 = vld [vmem:[%s4897_s2 + $0x208] sm:$0xff]  ;;  %v2671_v61 = vpack.c.bf16 %v130_v54, %v123_v53 }
  0x20   :  { %2728 = vmatpush1.bf16.msra.mxu1 %v2727_v43  ;;  %v125_v59 = vld [vmem:[%s4897_s2 + $0x1d0] sm:$0xff]  ;;  %v140_v62 = vld [vmem:[%s4897_s2 + $0x248] sm:$0xff]  ;;  %v147_v63 = vld [vmem:[%s4897_s2 + $0x280] sm:$0xff]  ;;  %v2673_v1 = vpack.c.bf16 %v145_v57, %v138_v56 }
  0x21   :  { %2730 = vmatprep.subr.bf16.mxu1 %v2729_v46  ;;  %v137_v2 = vld [vmem:[%s4897_s2 + $0x230] sm:$0xff]  ;;  %v144_v3 = vld [vmem:[%s4897_s2 + $0x268] sm:$0xff]  ;;  %v2735_v4 = vpack.c.bf16 %v132_v60, %v125_v59  ;;  %v159_v6 = vld [vmem:[%s4897_s2 + $0x2e0] sm:$0xff]  ;;  %v2737_v7 = vpack.c.bf16 %v147_v63, %v140_v62 }
  0x22   :  { %2668 = vmatpush1.bf16.msra.mxu0 %v2667_v49  ;;  %v152_v5 = vld [vmem:[%s4897_s2 + $0x2a8] sm:$0xff]  ;;  %v139_v8 = vld [vmem:[%s4897_s2 + $0x240] sm:$0xff]  ;;  %v146_v9 = vld [vmem:[%s4897_s2 + $0x278] sm:$0xff]  ;;  %v2675_v10 = vpack.c.bf16 %v144_v3, %v137_v2 }
  0x23   :  { %2670 = vmatprep.subr.bf16.mxu0 %v2669_v52  ;;  %v154_v11 = vld [vmem:[%s4897_s2 + $0x2b8] sm:$0xff]  ;;  %v161_v12 = vld [vmem:[%s4897_s2 + $0x2f0] sm:$0xff]  ;;  %v2677_v13 = vpack.c.bf16 %v159_v6, %v152_v5  ;;  %v151_v14 = vld [vmem:[%s4897_s2 + $0x2a0] sm:$0xff]  ;;  %v2739_v16 = vpack.c.bf16 %v146_v9, %v139_v8 }
  0x24   :  { %2732 = vmatpush1.bf16.msra.mxu1 %v2731_v55  ;;  %v158_v15 = vld [vmem:[%s4897_s2 + $0x2d8] sm:$0xff]  ;;  %v173_v18 = vld [vmem:[%s4897_s2 + $0x350] sm:$0xff]  ;;  %v2741_v19 = vpack.c.bf16 %v161_v12, %v154_v11  ;;  %v160_v21 = vld [vmem:[%s4897_s2 + $0x2e8] sm:$0xff] }
  0x25   :  { %2734 = vmatprep.subr.bf16.mxu1 %v2733_v58  ;;  %v166_v17 = vld [vmem:[%s4897_s2 + $0x318] sm:$0xff]  ;;  %v153_v20 = vld [vmem:[%s4897_s2 + $0x2b0] sm:$0xff]  ;;  %v2679_v22 = vpack.c.bf16 %v158_v15, %v151_v14  ;;  %v168_v23 = vld [vmem:[%s4897_s2 + $0x328] sm:$0xff] }
  0x26   :  { %2672 = vmatpush1.bf16.msra.mxu0 %v2671_v61  ;;  %v175_v24 = vld [vmem:[%s4897_s2 + $0x360] sm:$0xff]  ;;  %v2681_v25 = vpack.c.bf16 %v173_v18, %v166_v17  ;;  %v165_v26 = vld [vmem:[%s4897_s2 + $0x310] sm:$0xff]  ;;  %v172_v27 = vld [vmem:[%s4897_s2 + $0x348] sm:$0xff]  ;;  %v2743_v28 = vpack.c.bf16 %v160_v21, %v153_v20 }
  0x27   :  { %2674 = vmatprep.subr.bf16.mxu0 %v2673_v1  ;;  %v180_v29 = vld [vmem:[%s4897_s2 + $0x388] sm:$0xff]  ;;  %v187_v30 = vld [vmem:[%s4897_s2 + $0x3c0] sm:$0xff]  ;;  %v2745_v31 = vpack.c.bf16 %v175_v24, %v168_v23  ;;  %v174_v33 = vld [vmem:[%s4897_s2 + $0x358] sm:$0xff]  ;;  %v2683_v34 = vpack.c.bf16 %v172_v27, %v165_v26 }
  0x28   :  { %2736 = vmatpush1.bf16.msra.mxu1 %v2735_v4  ;;  %v167_v32 = vld [vmem:[%s4897_s2 + $0x320] sm:$0xff]  ;;  %v182_v35 = vld [vmem:[%s4897_s2 + $0x398] sm:$0xff]  ;;  %v189_v36 = vld [vmem:[%s4897_s2 + $0x3d0] sm:$0xff]  ;;  %v2685_v37 = vpack.c.bf16 %v187_v30, %v180_v29 }
  0x29   :  { %2738 = vmatprep.subr.bf16.mxu1 %v2737_v7  ;;  %v179_v38 = vld [vmem:[%s4897_s2 + $0x380] sm:$0xff]  ;;  %v186_v39 = vld [vmem:[%s4897_s2 + $0x3b8] sm:$0xff]  ;;  %v2747_v40 = vpack.c.bf16 %v174_v33, %v167_v32  ;;  %v201_v42 = vld [vmem:[%s4897_s2 + $0x430] sm:$0xff]  ;;  %v2749_v43 = vpack.c.bf16 %v189_v36, %v182_v35 }
  0x2a   :  { %2676 = vmatpush1.bf16.msra.mxu0 %v2675_v10  ;;  %v194_v41 = vld [vmem:[%s4897_s2 + $0x3f8] sm:$0xff]  ;;  %v181_v44 = vld [vmem:[%s4897_s2 + $0x390] sm:$0xff]  ;;  %v188_v45 = vld [vmem:[%s4897_s2 + $0x3c8] sm:$0xff]  ;;  %v2687_v46 = vpack.c.bf16 %v186_v39, %v179_v38 }
  0x2b   :  { %2678 = vmatprep.subr.bf16.mxu0 %v2677_v13  ;;  %v196_v47 = vld [vmem:[%s4897_s2 + $0x408] sm:$0xff]  ;;  %v203_v48 = vld [vmem:[%s4897_s2 + $0x440] sm:$0xff]  ;;  %v2689_v49 = vpack.c.bf16 %v201_v42, %v194_v41  ;;  %v193_v50 = vld [vmem:[%s4897_s2 + $0x3f0] sm:$0xff]  ;;  %v2751_v52 = vpack.c.bf16 %v188_v45, %v181_v44  ;;  %v3214_v45 = vmov 1  }
  0x2c   :  { %2740 = vmatpush1.bf16.msra.mxu1 %v2739_v16  ;;  %v200_v51 = vld [vmem:[%s4897_s2 + $0x428] sm:$0xff]  ;;  %v215_v54 = vld [vmem:[%s4897_s2 + $0x4a0] sm:$0xff]  ;;  %v2753_v55 = vpack.c.bf16 %v203_v48, %v196_v47  ;;  %v202_v57 = vld [vmem:[%s4897_s2 + $0x438] sm:$0xff] }
  0x2d   :  { %2742 = vmatprep.subr.bf16.mxu1 %v2741_v19  ;;  %v208_v53 = vld [vmem:[%s4897_s2 + $0x468] sm:$0xff]  ;;  %v195_v56 = vld [vmem:[%s4897_s2 + $0x400] sm:$0xff]  ;;  %v2691_v58 = vpack.c.bf16 %v200_v51, %v193_v50  ;;  %v210_v59 = vld [vmem:[%s4897_s2 + $0x478] sm:$0xff] }
  0x2e   :  { %2680 = vmatpush1.bf16.msra.mxu0 %v2679_v22  ;;  %v217_v60 = vld [vmem:[%s4897_s2 + $0x4b0] sm:$0xff]  ;;  %v2693_v61 = vpack.c.bf16 %v215_v54, %v208_v53  ;;  %v207_v62 = vld [vmem:[%s4897_s2 + $0x460] sm:$0xff]  ;;  %v214_v63 = vld [vmem:[%s4897_s2 + $0x498] sm:$0xff]  ;;  %v2755_v1 = vpack.c.bf16 %v202_v57, %v195_v56 }
  0x2f   :  { %2682 = vmatprep.subr.bf16.mxu0 %v2681_v25  ;;  %v222_v2 = vld [vmem:[%s4897_s2 + $0x4d8] sm:$0xff]  ;;  %v229_v3 = vld [vmem:[%s4897_s2 + $0x510] sm:$0xff]  ;;  %v2757_v4 = vpack.c.bf16 %v217_v60, %v210_v59  ;;  %v216_v6 = vld [vmem:[%s4897_s2 + $0x4a8] sm:$0xff]  ;;  %v2695_v7 = vpack.c.bf16 %v214_v63, %v207_v62  ;;  %v3215_v62 = vmov 2  }
  0x30   :  { %2744 = vmatpush1.bf16.msra.mxu1 %v2743_v28  ;;  %v209_v5 = vld [vmem:[%s4897_s2 + $0x470] sm:$0xff]  ;;  %v224_v8 = vld [vmem:[%s4897_s2 + $0x4e8] sm:$0xff]  ;;  %v231_v9 = vld [vmem:[%s4897_s2 + $0x520] sm:$0xff]  ;;  %v2697_v10 = vpack.c.bf16 %v229_v3, %v222_v2 }
  0x31   :  { %2746 = vmatprep.subr.bf16.mxu1 %v2745_v31  ;;  %v221_v11 = vld [vmem:[%s4897_s2 + $0x4d0] sm:$0xff]  ;;  %v228_v12 = vld [vmem:[%s4897_s2 + $0x508] sm:$0xff]  ;;  %v2759_v14 = vpack.c.bf16 %v216_v6, %v209_v5  ;;  %v243_v16 = vld [vmem:[%s4897_s2 + $0x580] sm:$0xff]  ;;  %v2761_v17 = vpack.c.bf16 %v231_v9, %v224_v8 }
  0x32   :  { %2684 = vmatpush1.bf16.msra.mxu0 %v2683_v34  ;;  %v3568_v13 = vld [vmem:[%s4895_s0 + $0x8] sm:$0xff]  ;;  %v223_v18 = vld [vmem:[%s4897_s2 + $0x4e0] sm:$0xff]  ;;  %v230_v19 = vld [vmem:[%s4897_s2 + $0x518] sm:$0xff]  ;;  %v2699_v20 = vpack.c.bf16 %v228_v12, %v221_v11 }
  0x33   :  { %2686 = vmatprep.subr.bf16.mxu0 %v2685_v37  ;;  %v236_v15 = vld [vmem:[%s4897_s2 + $0x548] sm:$0xff]  ;;  %355 = vmatprep.mubr.f32.mxu0 %v3568_v13  ;;  %v238_v21 = vld [vmem:[%s4897_s2 + $0x558] sm:$0xff]  ;;  %v245_v22 = vld [vmem:[%s4897_s2 + $0x590] sm:$0xff]  ;;  %v2763_v26 = vpack.c.bf16 %v230_v19, %v223_v18 }
  0x34   :  { %2748 = vmatpush1.bf16.msra.mxu1 %v2747_v40  ;;  %468 = vmatprep.mubr.f32.mxu1 %v3568_v13  ;;  %v2701_v23 = vpack.c.bf16 %v243_v16, %v236_v15  ;;  %v235_v24 = vld [vmem:[%s4897_s2 + $0x540] sm:$0xff]  ;;  %v242_v25 = vld [vmem:[%s4897_s2 + $0x578] sm:$0xff]  ;;  %v257_v28 = vld [vmem:[%s4897_s2 + $0x5f0] sm:$0xff]  ;;  %v2765_v30 = vpack.c.bf16 %v245_v22, %v238_v21 }
  0x35   :  { %2750 = vmatprep.subr.bf16.mxu1 %v2749_v43  ;;  %v250_v27 = vld [vmem:[%s4897_s2 + $0x5b8] sm:$0xff]  ;;  %v3605_v29 = vld [vmem:[%s4896_s1 + $0x8] sm:$0xff]  ;;  %v237_v31 = vld [vmem:[%s4897_s2 + $0x550] sm:$0xff]  ;;  %v2703_v33 = vpack.c.bf16 %v242_v25, %v235_v24 }
  0x36   :  { %2688 = vmatpush1.bf16.msra.mxu0 %v2687_v46  ;;  %v244_v32 = vld [vmem:[%s4897_s2 + $0x588] sm:$0xff]  ;;  %742 = vperm.xlu1 %3061, %v3605_v29   ;;  %v259_v35 = vld [vmem:[%s4897_s2 + $0x600] sm:$0xff]  ;;  %v2705_v36 = vpack.c.bf16 %v257_v28, %v250_v27  ;;  %v249_v37 = vld [vmem:[%s4897_s2 + $0x5b0] sm:$0xff] }
  0x37   :  { %2690 = vmatprep.subr.bf16.mxu0 %v2689_v49  ;;  %v252_v34 = vld [vmem:[%s4897_s2 + $0x5c8] sm:$0xff]  ;;  %v2767_v39 = vpack.c.bf16 %v244_v32, %v237_v31  ;;  %v271_v41 = vld [vmem:[%s4897_s2 + $0x660] sm:$0xff]  ;;  %v258_v44 = vld [vmem:[%s4897_s2 + $0x5f8] sm:$0xff] }
  0x38   :  { %2752 = vmatpush1.bf16.msra.mxu1 %v2751_v52  ;;  %v256_v38 = vld [vmem:[%s4897_s2 + $0x5e8] sm:$0xff]  ;;  %v2769_v42 = vpack.c.bf16 %v259_v35, %v252_v34  ;;  %v251_v43 = vld [vmem:[%s4897_s2 + $0x5c0] sm:$0xff]  ;;  %v266_v47 = vld [vmem:[%s4897_s2 + $0x638] sm:$0xff] }
  0x39   :  { %2754 = vmatprep.subr.bf16.mxu1 %v2753_v55  ;;  %v264_v40 = vld [vmem:[%s4897_s2 + $0x628] sm:$0xff]  ;;  %v2707_v46 = vpack.c.bf16 %v256_v38, %v249_v37  ;;  %v273_v48 = vld [vmem:[%s4897_s2 + $0x670] sm:$0xff]  ;;  %v3649_v49 = vld [vmem:[%s4896_s1] sm:$0xff]  ;;  %v2771_v53 = vpack.c.bf16 %v258_v44, %v251_v43 }
  0x3a   :  { %2692 = vmatpush1.bf16.msra.mxu0 %v2691_v58  ;;  %3062 = vset.pattern.permute.xlu1 %v3214_v45  ;;  %v2709_v50 = vpack.c.bf16 %v271_v41, %v264_v40  ;;  %v263_v51 = vld [vmem:[%s4897_s2 + $0x620] sm:$0xff]  ;;  %v270_v52 = vld [vmem:[%s4897_s2 + $0x658] sm:$0xff]  ;;  %v285_v55 = vld [vmem:[%s4897_s2 + $0x6d0] sm:$0xff]  ;;  %v2773_v56 = vpack.c.bf16 %v273_v48, %v266_v47 }
  0x3b   :  { %2694 = vmatprep.subr.bf16.mxu0 %v2693_v61  ;;  %788 = vperm.xlu1 %3062, %v3605_v29   ;;  %v278_v54 = vld [vmem:[%s4897_s2 + $0x698] sm:$0xff]  ;;  %v265_v57 = vld [vmem:[%s4897_s2 + $0x630] sm:$0xff]  ;;  %v272_v58 = vld [vmem:[%s4897_s2 + $0x668] sm:$0xff]  ;;  %v2711_v59 = vpack.c.bf16 %v270_v52, %v263_v51 }
  0x3c   :  { %2756 = vmatpush1.bf16.msra.mxu1 %v2755_v1  ;;  %737 = vperm.xlu0 %3059, %v3649_v49   ;;  %v280_v60 = vld [vmem:[%s4897_s2 + $0x6a8] sm:$0xff]  ;;  %v287_v61 = vld [vmem:[%s4897_s2 + $0x6e0] sm:$0xff]  ;;  %v2713_v63 = vpack.c.bf16 %v285_v55, %v278_v54  ;;  %v277_v1 = vld [vmem:[%s4897_s2 + $0x690] sm:$0xff]  ;;  %v2775_v3 = vpack.c.bf16 %v272_v58, %v265_v57 }
  0x3d   :  { %2758 = vmatprep.subr.bf16.mxu1 %v2757_v4  ;;  %v284_v2 = vld [vmem:[%s4897_s2 + $0x6c8] sm:$0xff]  ;;  %v79_v5 = vld [vmem:[%s4897_s2 + $0x60] sm:$0xff]  ;;  %v2777_v6 = vpack.c.bf16 %v287_v61, %v280_v60  ;;  %v286_v8 = vld [vmem:[%s4897_s2 + $0x6d8] sm:$0xff] }
  0x3e   :  { %2696 = vmatpush1.bf16.msra.mxu0 %v2695_v7  ;;  %v72_v4 = vld [vmem:[%s4897_s2 + $0x28] sm:$0xff]  ;;  %v279_v7 = vld [vmem:[%s4897_s2 + $0x6a0] sm:$0xff]  ;;  %v3700_v9 = vld [vmem:[%s4896_s1 + $0x10] sm:$0xff] }
  0x3f   :  { %2698 = vmatprep.subr.bf16.mxu0 %v2697_v10  ;;  %3063 = vset.pattern.permute.xlu1 %v3215_v62  ;;  %v2715_v10 = vpack.c.bf16 %v284_v2, %v277_v1  ;;  %v185_v11 = vld [vmem:[%s4897_s2 + $0x3b0] sm:$0xff]  ;;  %v192_v12 = vld [vmem:[%s4897_s2 + $0x3e8] sm:$0xff]  ;;  %v71_v15 = vld [vmem:[%s4897_s2 + $0x20] sm:$0xff] }
  0x40   :  { %2760 = vmatpush1.bf16.msra.mxu1 %v2759_v14  ;;  %832 = vperm.xlu1 %3063, %v3649_v49   ;;  %v2781_v14 = vpack.c.bf16 %v79_v5, %v72_v4  ;;  %v78_v16 = vld [vmem:[%s4897_s2 + $0x58] sm:$0xff]  ;;  %v93_v19 = vld [vmem:[%s4897_s2 + $0xd0] sm:$0xff]  ;;  %v80_v22 = vld [vmem:[%s4897_s2 + $0x68] sm:$0xff] }
  0x41   :  { %2762 = vmatprep.subr.bf16.mxu1 %v2761_v17  ;;  %3060 = vset.pattern.permute.xlu0 %v3214_v45  ;;  %v2779_v17 = vpack.c.bf16 %v286_v8, %v279_v7  ;;  %v86_v18 = vld [vmem:[%s4897_s2 + $0x98] sm:$0xff]  ;;  %v73_v21 = vld [vmem:[%s4897_s2 + $0x30] sm:$0xff]  ;;  %v2783_v24 = vpack.c.bf16 %v78_v16, %v71_v15  ;;  %v92_v28 = vld [vmem:[%s4897_s2 + $0xc8] sm:$0xff] }
  0x42   :  { %2700 = vmatpush1.bf16.msra.mxu0 %v2699_v20  ;;  %784 = vperm.xlu0 %3060, %v3649_v49   ;;  %v2845_v20 = vpack.c.bf16 %v192_v12, %v185_v11  ;;  %v3739_v25 = vld [vmem:[%s4895_s0 + $0x18] sm:$0xff]  ;;  %v85_v27 = vld [vmem:[%s4897_s2 + $0x90] sm:$0xff]  ;;  %v107_v31 = vld [vmem:[%s4897_s2 + $0x140] sm:$0xff]  ;;  %v2847_v32 = vpack.c.bf16 %v80_v22, %v73_v21 }
  0x43   :  { %2702 = vmatprep.subr.bf16.mxu0 %v2701_v23  ;;  %v3733_v23 = vld [vmem:[%s4895_s0] sm:$0xff]  ;;  %v206_v34 = vld [vmem:[%s4897_s2 + $0x458] sm:$0xff]  ;;  %v3765_v35 = vld [vmem:[%s4895_s0 + $0x10] sm:$0xff] }
  0x44   :  { %2764 = vmatpush1.bf16.msra.mxu1 %v2763_v26  ;;  %3065 = vset.pattern.permute.xlu1 %v3213_v0  ;;  %v2785_v26 = vpack.c.bf16 %v93_v19, %v86_v18  ;;  %v87_v37 = vld [vmem:[%s4897_s2 + $0xa0] sm:$0xff]  ;;  %v94_v38 = vld [vmem:[%s4897_s2 + $0xd8] sm:$0xff]  ;;  %v121_v44 = vld [vmem:[%s4897_s2 + $0x1b0] sm:$0xff] }
  0x45   :  { %2766 = vmatprep.subr.bf16.mxu1 %v2765_v30  ;;  %747 = vperm.xlu1 %3065, %v3700_v9   ;;  %v100_v30 = vld [vmem:[%s4897_s2 + $0x108] sm:$0xff]  ;;  %v99_v40 = vld [vmem:[%s4897_s2 + $0x100] sm:$0xff]  ;;  %v106_v41 = vld [vmem:[%s4897_s2 + $0x138] sm:$0xff]  ;;  %v2851_v47 = vpack.c.bf16 %v94_v38, %v87_v37 }
  0x46   :  { %2704 = vmatpush1.bf16.msra.mxu0 %v2703_v33  ;;  %3064 = vset.pattern.permute.xlu0 %v3215_v62  ;;  %v199_v33 = vld [vmem:[%s4897_s2 + $0x420] sm:$0xff]  ;;  %v114_v43 = vld [vmem:[%s4897_s2 + $0x178] sm:$0xff]  ;;  %v2791_v48 = vpack.c.bf16 %v106_v41, %v99_v40  ;;  %v113_v51 = vld [vmem:[%s4897_s2 + $0x170] sm:$0xff] }
  0x47   :  { %2706 = vmatprep.subr.bf16.mxu0 %v2705_v36  ;;  %836 = vperm.xlu0 %3064, %v3605_v29   ;;  %v2787_v36 = vpack.c.bf16 %v92_v28, %v85_v27  ;;  %v120_v52 = vld [vmem:[%s4897_s2 + $0x1a8] sm:$0xff]  ;;  %v3810_v54 = vld [vmem:[%s4895_s0 + $0x38] sm:$0xff]  ;;  %v213_v55 = vld [vmem:[%s4897_s2 + $0x490] sm:$0xff] }
  0x48   :  { %2768 = vmatpush1.bf16.msra.mxu1 %v2767_v39  ;;  %v2789_v39 = vpack.c.bf16 %v107_v31, %v100_v30  ;;  %v128_v57 = vld [vmem:[%s4897_s2 + $0x1e8] sm:$0xff]  ;;  %v135_v58 = vld [vmem:[%s4897_s2 + $0x220] sm:$0xff]  ;;  %v101_v60 = vld [vmem:[%s4897_s2 + $0x110] sm:$0xff] }
  0x49   :  { %2770 = vmatprep.subr.bf16.mxu1 %v2769_v42  ;;  %3066 = vset.pattern.permute.xlu1 %v3214_v45  ;;  %v3783_v42 = vld [vmem:[%s4895_s0 + $0x28] sm:$0xff]  ;;  %v3841_v1 = vld [vmem:[%s4896_s1 + $0x18] sm:$0xff]  ;;  %v2797_v5 = vpack.c.bf16 %v135_v58, %v128_v57  ;;  %v241_v18 = vld [vmem:[%s4897_s2 + $0x570] sm:$0xff] }
  0x4a   :  { %2708 = vmatpush1.bf16.msra.mxu0 %v2707_v46  ;;  %v2849_v46 = vpack.c.bf16 %v206_v34, %v199_v33  ;;  %792 = vperm.xlu1 %3066, %v3700_v9   ;;  %v108_v61 = vld [vmem:[%s4897_s2 + $0x148] sm:$0xff]  ;;  %v234_v4 = vld [vmem:[%s4897_s2 + $0x538] sm:$0xff]  ;;  %v141_v21 = vld [vmem:[%s4897_s2 + $0x250] sm:$0xff] }
  0x4b   :  { %2710 = vmatprep.subr.bf16.mxu0 %v2709_v50  ;;  %v3798_v50 = vld [vmem:[%s4895_s0 + $0x20] sm:$0xff]  ;;  %v134_v7 = vld [vmem:[%s4897_s2 + $0x218] sm:$0xff]  ;;  %v2855_v11 = vpack.c.bf16 %v108_v61, %v101_v60  ;;  %v3875_v16 = vld [vmem:[%s4895_s0 + $0x48] sm:$0xff] }
  0x4c   :  { %2772 = vmatpush1.bf16.msra.mxu1 %v2771_v53  ;;  %v2793_v53 = vpack.c.bf16 %v121_v44, %v114_v43  ;;  %v142_v8 = vld [vmem:[%s4897_s2 + $0x258] sm:$0xff]  ;;  %v248_v19 = vld [vmem:[%s4897_s2 + $0x5a8] sm:$0xff]  ;;  %v3900_v28 = vld [vmem:[%s4895_s0 + $0x40] sm:$0xff] }
  0x4d   :  { %2774 = vmatprep.subr.bf16.mxu1 %v2773_v56  ;;  %v220_v56 = vld [vmem:[%s4897_s2 + $0x4c8] sm:$0xff]  ;;  %v122_v15 = vld [vmem:[%s4897_s2 + $0x1b8] sm:$0xff]  ;;  %v2861_v30 = vpack.c.bf16 %v248_v19, %v241_v18  ;;  %v129_v31 = vld [vmem:[%s4897_s2 + $0x1f0] sm:$0xff] }
  0x4e   :  { %2712 = vmatpush1.bf16.msra.mxu0 %v2711_v59  ;;  %v3829_v59 = vld [vmem:[%s4895_s0 + $0x30] sm:$0xff]  ;;  %v2853_v2 = vpack.c.bf16 %v220_v56, %v213_v55  ;;  %3068 = vset.pattern.permute.xlu1 %v3213_v0  ;;  %v148_v22 = vld [vmem:[%s4897_s2 + $0x288] sm:$0xff]  ;;  %v3912_v33 = vld [vmem:[%s4895_s0 + $0x58] sm:$0xff] }
  0x4f   :  { %2714 = vmatprep.subr.bf16.mxu0 %v2713_v63  ;;  %v2795_v63 = vpack.c.bf16 %v120_v52, %v113_v51  ;;  %752 = vperm.xlu1 %3068, %v3841_v1   ;;  %v2803_v34 = vpack.c.bf16 %v148_v22, %v141_v21  ;;  %v262_v37 = vld [vmem:[%s4897_s2 + $0x618] sm:$0xff]  ;;  %v177_v43 = vld [vmem:[%s4897_s2 + $0x370] sm:$0xff]  ;;  %v276_v55 = vld [vmem:[%s4897_s2 + $0x688] sm:$0xff] }
  0x50   :  { %2776 = vmatpush1.bf16.msra.mxu1 %v2775_v3  ;;  %v227_v3 = vld [vmem:[%s4897_s2 + $0x500] sm:$0xff]  ;;  %v162_v40 = vld [vmem:[%s4897_s2 + $0x2f8] sm:$0xff]  ;;  %v3946_v52 = vld [vmem:[%s4895_s0 + $0x50] sm:$0xff] }
  0x51   :  { %2778 = vmatprep.subr.bf16.mxu1 %v2777_v6  ;;  %v127_v6 = vld [vmem:[%s4897_s2 + $0x1e0] sm:$0xff]  ;;  %v2857_v12 = vpack.c.bf16 %v234_v4, %v227_v3  ;;  %v170_v41 = vld [vmem:[%s4897_s2 + $0x338] sm:$0xff]  ;;  %v169_v57 = vld [vmem:[%s4897_s2 + $0x330] sm:$0xff] }
  0x52   :  { %2716 = vmatpush1.bf16.msra.mxu0 %v2715_v10  ;;  %v149_v10 = vld [vmem:[%s4897_s2 + $0x290] sm:$0xff]  ;;  %v2809_v56 = vpack.c.bf16 %v177_v43, %v170_v41  ;;  %v176_v58 = vld [vmem:[%s4897_s2 + $0x368] sm:$0xff]  ;;  %v283_v18 = vld [vmem:[%s4897_s2 + $0x6c0] sm:$0xff] }
  0x53   :  { %2782 = vmatprep.subr.bf16.mxu0 %v2781_v14  ;;  %v115_v14 = vld [vmem:[%s4897_s2 + $0x180] sm:$0xff]  ;;  %3069 = vset.pattern.permute.xlu1 %v3214_v45  ;;  %v3964_v60 = vld [vmem:[%s4895_s0 + $0x68] sm:$0xff]  ;;  %v157_v4 = vld [vmem:[%s4897_s2 + $0x2d0] sm:$0xff] }
  0x54   :  { %2780 = vmatpush1.bf16.msra.mxu1 %v2779_v17  ;;  %v2799_v17 = vpack.c.bf16 %v134_v7, %v127_v6  ;;  %v2859_v27 = vpack.c.bf16 %v122_v15, %v115_v14  ;;  %796 = vperm.xlu1 %3069, %v3841_v1   ;;  %v184_v61 = vld [vmem:[%s4897_s2 + $0x3a8] sm:$0xff]  ;;  %v2811_v6 = vpack.c.bf16 %v176_v58, %v169_v57  ;;  %v183_v7 = vld [vmem:[%s4897_s2 + $0x3a0] sm:$0xff]  ;;  %v3999_v14 = vld [vmem:[%s4895_s0 + $0x78] sm:$0xff]  ;;  %v3218_v58 = vmov 3  }
  0x55   :  { %356 = vmatmul.mubr.f32.vlgmr.msra.gmra.mrb[0].mxu0 %v3733_v23  ;;  %2846 = vmatprep.subr.bf16.mxu1 %v2845_v20  ;;  %v2801_v20 = vpack.c.bf16 %v149_v10, %v142_v8  ;;  %v3987_v8 = vld [vmem:[%s4895_s0 + $0x60] sm:$0xff]  ;;  %v205_v15 = vld [vmem:[%s4897_s2 + $0x450] sm:$0xff]  ;;  %v290_v19 = vld [vmem:[%s4897_s2 + $0x6f8] sm:$0xff] }
  0x56   :  { %2784 = vmatpush1.bf16.msra.mxu0 %v2783_v24  ;;  %361 = vmatprep.mubr.f32.mxu0 %v3739_v25  ;;  %v156_v24 = vld [vmem:[%s4897_s2 + $0x2c8] sm:$0xff]  ;;  %v178_v21 = vld [vmem:[%s4897_s2 + $0x378] sm:$0xff] }
  0x57   :  { %469 = vmatmul.mubr.f32.vlgmr.msra.gmra.mrb[0].mxu1 %v3733_v23  ;;  %2786 = vmatprep.subr.bf16.mxu0 %v2785_v26  ;;  %v163_v26 = vld [vmem:[%s4897_s2 + $0x300] sm:$0xff]  ;;  %v218_v41 = vld [vmem:[%s4897_s2 + $0x4b8] sm:$0xff] }
  0x58   :  { %474 = vmatprep.mubr.f32.mxu1 %v3739_v25  ;;  %2848 = vmatpush3.bf16.msra.mxu1 %v2847_v32  ;;  %v136_v32 = vld [vmem:[%s4897_s2 + $0x228] sm:$0xff]  ;;  %v2805_v38 = vpack.c.bf16 %v163_v26, %v156_v24  ;;  %v197_v26 = vld [vmem:[%s4897_s2 + $0x410] sm:$0xff]  ;;  %v226_v43 = vld [vmem:[%s4897_s2 + $0x4f8] sm:$0xff] }
  0x59   :  { %362 = vmatmul.mubr.f32.gmra.mrb[2].mxu0 %v3765_v35  ;;  %2850 = vmatprep.subr.bf16.mxu1 %v2849_v46  ;;  %v2863_v44 = vpack.c.bf16 %v136_v32, %v129_v31  ;;  %v2873_v31 = vpack.c.bf16 %v290_v19, %v283_v18  ;;  %v212_v32 = vld [vmem:[%s4897_s2 + $0x488] sm:$0xff]  ;;  %v274_v18 = vld [vmem:[%s4897_s2 + $0x678] sm:$0xff] }
  0x5a   :  { %2788 = vmatpush1.bf16.msra.mxu0 %v2787_v36  ;;  %367 = vmatprep.mubr.f32.mxu0 %v3783_v42  ;;  %v255_v36 = vld [vmem:[%s4897_s2 + $0x5e0] sm:$0xff]  ;;  %v282_v19 = vld [vmem:[%s4897_s2 + $0x6b8] sm:$0xff] }
  0x5b   :  { %475 = vmatmul.mubr.f32.gmra.mrb[2].mxu1 %v3765_v35  ;;  %2790 = vmatprep.subr.bf16.mxu0 %v2789_v39  ;;  %v155_v39 = vld [vmem:[%s4897_s2 + $0x2c0] sm:$0xff]  ;;  %v2865_v46 = vpack.c.bf16 %v262_v37, %v255_v36  ;;  %v3216_v36 = vmov 4  }
  0x5c   :  { %480 = vmatprep.mubr.f32.mxu1 %v3783_v42  ;;  %2852 = vmatpush3.bf16.msra.mxu1 %v2851_v47  ;;  %v143_v47 = vld [vmem:[%s4897_s2 + $0x260] sm:$0xff]  ;;  %v2807_v51 = vpack.c.bf16 %v162_v40, %v155_v39 }
  0x5d   :  { %368 = vmatmul.mubr.f32.gmra.mrb[4].mxu0 %v3798_v50  ;;  %2854 = vmatprep.subr.bf16.mxu1 %v2853_v2  ;;  %v211_v40 = vld [vmem:[%s4897_s2 + $0x480] sm:$0xff] }
  0x5e   :  { %2792 = vmatpush1.bf16.msra.mxu0 %v2791_v48  ;;  %373 = vmatprep.mubr.f32.mxu0 %v3810_v54  ;;  %v150_v48 = vld [vmem:[%s4897_s2 + $0x298] sm:$0xff] }
  0x5f   :  { %2794 = vmatprep.subr.bf16.mxu0 %v2793_v53  ;;  %481 = vmatmul.mubr.f32.gmra.mrb[4].mxu1 %v3798_v50  ;;  %v269_v53 = vld [vmem:[%s4897_s2 + $0x650] sm:$0xff]  ;;  %v2867_v2 = vpack.c.bf16 %v150_v48, %v143_v47  ;;  %v2823_v47 = vpack.c.bf16 %v218_v41, %v211_v40  ;;  %v1082_v40 = vld [vmem:[#allocation2 + $0x58] sm:$0xff] }
  0x60   :  { %486 = vmatprep.mubr.f32.mxu1 %v3810_v54  ;;  %2856 = vmatpush3.bf16.msra.mxu1 %v2855_v11  ;;  %v2869_v3 = vpack.c.bf16 %v276_v55, %v269_v53  ;;  %v190_v11 = vld [vmem:[%s4897_s2 + $0x3d8] sm:$0xff]  ;;  %v232_v53 = vld [vmem:[%s4897_s2 + $0x528] sm:$0xff] }
  0x61   :  { %374 = vmatmul.mubr.f32.gmra.mrb[6].mxu0 %v3829_v59  ;;  %2858 = vmatprep.subr.bf16.mxu1 %v2857_v12  ;;  %v198_v12 = vld [vmem:[%s4897_s2 + $0x418] sm:$0xff]  ;;  %v2815_v22 = vpack.c.bf16 %v190_v11, %v183_v7  ;;  %v240_v55 = vld [vmem:[%s4897_s2 + $0x568] sm:$0xff]  ;;  %v275_v11 = vld [vmem:[%s4897_s2 + $0x680] sm:$0xff] }
  0x62   :  { %2796 = vmatpush1.bf16.msra.mxu0 %v2795_v63  ;;  %379 = vmatprep.mubr.f32.mxu0 %v3875_v16  ;;  %v191_v63 = vld [vmem:[%s4897_s2 + $0x3e0] sm:$0xff]  ;;  %v2817_v24 = vpack.c.bf16 %v205_v15, %v198_v12  ;;  %v260_v7 = vld [vmem:[%s4897_s2 + $0x608] sm:$0xff] }
  0x63   :  { %2798 = vmatprep.subr.bf16.mxu0 %v2797_v5  ;;  %487 = vmatmul.mubr.f32.gmra.mrb[6].mxu1 %v3829_v59  ;;  %v164_v5 = vld [vmem:[%s4897_s2 + $0x308] sm:$0xff]  ;;  %v2813_v10 = vpack.c.bf16 %v191_v63, %v184_v61  ;;  %v239_v63 = vld [vmem:[%s4897_s2 + $0x560] sm:$0xff] }
  0x64   :  { %492 = vmatprep.mubr.f32.mxu1 %v3875_v16  ;;  %2860 = vmatpush3.bf16.msra.mxu1 %v2859_v27  ;;  %v204_v27 = vld [vmem:[%s4897_s2 + $0x448] sm:$0xff] }
  0x65   :  { %2862 = vmatprep.subr.bf16.mxu1 %v2861_v30  ;;  %3070 = vset.pattern.permute.xlu1 %v3215_v62  ;;  %v4029_v30 = vld [vmem:[%s4895_s0 + $0x70] sm:$0xff] }
  0x66   :  { %2800 = vmatpush1.bf16.msra.mxu0 %v2799_v17  ;;  %840 = vperm.xlu1 %3070, %v3700_v9   ;;  %v2871_v17 = vpack.c.bf16 %v164_v5, %v157_v4 }
  0x67   :  { %2802 = vmatprep.subr.bf16.mxu0 %v2801_v20  ;;  %493 = vmatmul.mubr.f32.gmra.mrb[8].mxu1 %v3900_v28  ;;  %v171_v20 = vld [vmem:[%s4897_s2 + $0x340] sm:$0xff] }
  0x68   :  { %498 = vmatprep.mubr.f32.mxu1 %v3912_v33  ;;  %2864 = vmatpush3.bf16.msra.mxu1 %v2863_v44  ;;  %v2875_v37 = vpack.c.bf16 %v178_v21, %v171_v20  ;;  %v233_v44 = vld [vmem:[%s4897_s2 + $0x530] sm:$0xff]  ;;  %v3219_v21 = vmov 6  }
  0x69   :  { %380 = vmatmul.mubr.f32.gmra.mrb[8].mxu0 %v3900_v28  ;;  %2866 = vmatprep.subr.bf16.mxu1 %v2865_v46  ;;  %v3217_v46 = vmov 5   ;;  %v2825_v48 = vpack.c.bf16 %v233_v44, %v226_v43  ;;  %v289_v20 = vld [vmem:[%s4897_s2 + $0x6f0] sm:$0xff]  ;;  %v1083_v44 = vld [vmem:[#allocation2 + $0x60] sm:$0xff] }
  0x6a   :  { %2804 = vmatpush1.bf16.msra.mxu0 %v2803_v34  ;;  %844 = vperm.xlu1 %3070, %v3841_v1   ;;  %v219_v34 = vld [vmem:[%s4897_s2 + $0x4c0] sm:$0xff] }
  0x6b   :  { %2806 = vmatprep.subr.bf16.mxu0 %v2805_v38  ;;  %499 = vmatmul.mubr.f32.gmra.mrb[10].mxu1 %v3946_v52  ;;  %v2819_v38 = vpack.c.bf16 %v204_v27, %v197_v26  ;;  %v2821_v39 = vpack.c.bf16 %v219_v34, %v212_v32  ;;  %v281_v26 = vld [vmem:[%s4897_s2 + $0x6b0] sm:$0xff]  ;;  %v288_v27 = vld [vmem:[%s4897_s2 + $0x6e8] sm:$0xff] }
  0x6c   :  { %504 = vmatprep.mubr.f32.mxu1 %v3964_v60  ;;  %2868 = vmatpush3.bf16.msra.mxu1 %v2867_v2  ;;  %v246_v2 = vld [vmem:[%s4897_s2 + $0x598] sm:$0xff] }
  0x6d   :  { %385 = vmatprep.mubr.f32.mxu0 %v3912_v33  ;;  %2870 = vmatprep.subr.bf16.mxu1 %v2869_v3  ;;  %v261_v3 = vld [vmem:[%s4897_s2 + $0x610] sm:$0xff]  ;;  %v2831_v4 = vpack.c.bf16 %v246_v2, %v239_v63 }
  0x6e   :  { %2808 = vmatpush1.bf16.msra.mxu0 %v2807_v51  ;;  %3071 = vset.pattern.permute.xlu1 %v3216_v36  ;;  %v225_v51 = vld [vmem:[%s4897_s2 + $0x4f0] sm:$0xff] }
  0x6f   :  { %2810 = vmatprep.subr.bf16.mxu0 %v2809_v56  ;;  %505 = vmatmul.mubr.f32.gmra.mrb[12].mxu1 %v3987_v8  ;;  %v247_v56 = vld [vmem:[%s4897_s2 + $0x5a0] sm:$0xff]  ;;  %v2827_v57 = vpack.c.bf16 %v232_v53, %v225_v51  ;;  %v1086_v51 = vld [vmem:[#allocation2 + $0x78] sm:$0xff] }
  0x70   :  { %510 = vmatprep.mubr.f32.mxu1 %v3999_v14  ;;  %386 = vmatmul.mubr.f32.gmra.mrb[10].mxu0 %v3946_v52  ;;  %v2829_v61 = vpack.c.bf16 %v247_v56, %v240_v55 }
  0x71   :  { %2872 = vmatpush3.bf16.msra.mxu1 %v2871_v17  ;;  %932 = vperm.xlu1 %3071, %v3605_v29   ;;  %v267_v17 = vld [vmem:[%s4897_s2 + $0x640] sm:$0xff] }
  0x72   :  { %2812 = vmatpush1.bf16.msra.mxu0 %v2811_v6  ;;  %391 = vmatprep.mubr.f32.mxu0 %v3964_v60  ;;  %v253_v6 = vld [vmem:[%s4897_s2 + $0x5d0] sm:$0xff] }
  0x73   :  { %2814 = vmatprep.subr.bf16.mxu0 %v2813_v10  ;;  %511 = vmatmul.mubr.f32.gmra.mrb[14].mxu1 %v4029_v30  ;;  %v268_v10 = vld [vmem:[%s4897_s2 + $0x648] sm:$0xff]  ;;  %v2835_v12 = vpack.c.bf16 %v260_v7, %v253_v6 }
  0x74   :  { %2874 = vmatprep.subr.bf16.mxu1 %v2873_v31  ;;  %392 = vmatmul.mubr.f32.gmra.mrb[12].mxu0 %v3987_v8  ;;  %v2837_v15 = vpack.c.bf16 %v275_v11, %v268_v10  ;;  %v2843_v31 = vpack.c.bf16 %v288_v27, %v281_v26 }
  0x75   :  { %2876 = vmatpush3.bf16.msra.mxu1 %v2875_v37  ;;  %3073 = vset.pattern.permute.xlu1 %v3217_v46 }
  0x76   :  { %2816 = vmatpush1.bf16.msra.mxu0 %v2815_v22  ;;  %694 = vmatprep.mubr.f32.mxu1 %v3568_v13  ;;  %v2839_v22 = vpack.c.bf16 %v274_v18, %v267_v17 }
  0x77   :  { %2818 = vmatprep.subr.bf16.mxu0 %v2817_v24  ;;  %976 = vperm.xlu1 %3073, %v3649_v49   ;;  %v2841_v24 = vpack.c.bf16 %v289_v20, %v282_v19 }
  0x78   :  { %397 = vmatprep.mubr.f32.mxu0 %v3999_v14  ;;  %695 = vmatmul.mubr.f32.vlgmr.msra.gmra.mrb[16].mxu1 %v3733_v23 }
  0x79   :  { %398 = vmatmul.mubr.f32.gmra.mrb[14].mxu0 %v4029_v30  ;;  %699 = vmatprep.mubr.f32.mxu1 %v3739_v25 }
  0x7a   :  { %2820 = vmatpush1.bf16.msra.mxu0 %v2819_v38  ;;  %581 = vmatprep.mubr.f32.mxu0 %v3568_v13  ;;  %v254_v13 = vld [vmem:[%s4897_s2 + $0x5d8] sm:$0xff] }
  0x7b   :  { %2822 = vmatprep.subr.bf16.mxu0 %v2821_v39  ;;  %3074 = vset.pattern.permute.xlu1 %v3218_v58  ;;  %v2833_v5 = vpack.c.bf16 %v261_v3, %v254_v13  ;;  %v1081_v39 = vld [vmem:[#allocation2 + $0x50] sm:$0xff] }
  0x7c   :  { %892 = vperm.xlu1 %3074, %v3841_v1   ;;  %700 = vmatmul.mubr.f32.gmra.mrb[18].mxu1 %v3765_v35  ;;  %v2897_v41 = vpack.c.bf16 %v1082_v40, %v1081_v39 }
  0x7d   :  { %3067 = vset.pattern.permute.xlu0 %v3218_v58  ;;  %704 = vmatprep.mubr.f32.mxu1 %v3783_v42 }
  0x7e   :  { %2824 = vmatpush1.bf16.msra.mxu0 %v2823_v47  ;;  %880 = vperm.xlu0 %3067, %v3649_v49   ;;  %v1084_v47 = vld [vmem:[#allocation2 + $0x68] sm:$0xff] }
  0x7f   :  { %2826 = vmatprep.subr.bf16.mxu0 %v2825_v48 }
  0x80   :  { %3075 = vset.pattern.permute.xlu1 %v3216_v36  ;;  %705 = vmatmul.mubr.f32.gmra.mrb[20].mxu1 %v3798_v50 }
  0x81   :  { %936 = vperm.xlu1 %3075, %v3700_v9   ;;  %709 = vmatprep.mubr.f32.mxu1 %v3810_v54 }
  0x82   :  { %2828 = vmatpush1.bf16.msra.mxu0 %v2827_v57  ;;  %884 = vperm.xlu0 %3067, %v3605_v29  }
  0x83   :  { %2830 = vmatprep.subr.bf16.mxu0 %v2829_v61 }
  0x84   :  { %710 = vmatmul.mubr.f32.gmra.mrb[22].mxu1 %v3829_v59 }
  0x85   :  { %3076 = vset.pattern.permute.xlu1 %v3219_v21  ;;  %714 = vmatprep.mubr.f32.mxu1 %v3875_v16 }
  0x86   :  { %2832 = vmatpush1.bf16.msra.mxu0 %v2831_v4  ;;  %1024 = vperm.xlu1 %3076, %v3649_v49  }
  0x87   :  { %2834 = vmatprep.subr.bf16.mxu0 %v2833_v5  ;;  %888 = vperm.xlu0 %3067, %v3700_v9  }
  0x88   :  { %715 = vmatmul.mubr.f32.gmra.mrb[24].mxu1 %v3900_v28 }
  0x89   :  { %719 = vmatprep.mubr.f32.mxu1 %v3912_v33 }
  0x8a   :  { %2836 = vmatpush1.bf16.msra.mxu0 %v2835_v12  ;;  %1028 = vperm.xlu1 %3076, %v3605_v29  }
  0x8b   :  { %2838 = vmatprep.subr.bf16.mxu0 %v2837_v15  ;;  %3072 = vset.pattern.permute.xlu0 %v3216_v36 }
  0x8c   :  { %928 = vperm.xlu0 %3072, %v3649_v49   ;;  %720 = vmatmul.mubr.f32.gmra.mrb[26].mxu1 %v3946_v52  ;;  %v4159_v49 = vld [vmem:[%s4896_s1 + $0x20] sm:$0xff] }
  0x8d   :  { %724 = vmatprep.mubr.f32.mxu1 %v3964_v60 }
  0x8e   :  { %2840 = vmatpush1.bf16.msra.mxu0 %v2839_v22  ;;  %3078 = vset.pattern.permute.xlu1 %v3217_v46 }
  0x8f   :  { %2842 = vmatprep.subr.bf16.mxu0 %v2841_v24  ;;  %984 = vperm.xlu1 %3078, %v3700_v9  }
  0x90   :  { %940 = vperm.xlu0 %3072, %v3841_v1   ;;  %725 = vmatmul.mubr.f32.gmra.mrb[28].mxu1 %v3987_v8 }
  0x91   :  { %729 = vmatprep.mubr.f32.mxu1 %v3999_v14 }
  0x92   :  { %2844 = vmatpush1.bf16.msra.mxu0 %v2843_v31 }
  0x93   :  { %3079 = vset.pattern.permute.xlu1 %v3219_v21 }
  0x94   :  { %1032 = vperm.xlu1 %3079, %v3700_v9   ;;  %3077 = vset.pattern.permute.xlu0 %v3217_v46  ;;  %v4186_v9 = vld [vmem:[%s4896_s1 + $0x30] sm:$0xff] }
  0x95   :  { %582 = vmatmul.mubr.f32.vlgmr.msra.gmra.mrb[16].mxu0 %v3733_v23  ;;  %730 = vmatmul.mubr.f32.gmra.mrb[30].mxu1 %v4029_v30 }
  0x96   :  { %587 = vmatprep.mubr.f32.mxu0 %v3739_v25  ;;  %980 = vperm.xlu0 %3077, %v3605_v29   ;;  %v4167_v29 = vld [vmem:[%s4896_s1 + $0x28] sm:$0xff]  ;;  %v1071_v25 = vld [vmem:[#allocation2] sm:$0xff] }
  0x98   :  { %1036 = vperm.xlu1 %3079, %v3841_v1  }
  0x99   :  { %588 = vmatmul.mubr.f32.gmra.mrb[18].mxu0 %v3765_v35  ;;  %v1072_v35 = vld [vmem:[#allocation2 + $0x8] sm:$0xff] }
  0x9a   :  { %593 = vmatprep.mubr.f32.mxu0 %v3783_v42  ;;  %988 = vperm.xlu0 %3077, %v3841_v1   ;;  %v2877_v42 = vpack.c.bf16 %v1072_v35, %v1071_v25  ;;  %v1075_v1 = vld [vmem:[#allocation2 + $0x20] sm:$0xff] }
  0x9c   :  { %3080 = vset.pattern.permute.xlu1 %v3214_v45  ;;  %2878 = vmatprep.subr.bf16.mxu1 %v2877_v42 }
  0x9d   :  { %594 = vmatmul.mubr.f32.gmra.mrb[20].mxu0 %v3798_v50  ;;  %800 = vperm.xlu1 %3080, %v4159_v49   ;;  %v1074_v50 = vld [vmem:[#allocation2 + $0x18] sm:$0xff] }
  0x9e   :  { %599 = vmatprep.mubr.f32.mxu0 %v3810_v54  ;;  %3082 = vset.pattern.permute.xlu0 %v3214_v45 }
  0x9f   :  { %804 = vperm.xlu0 %3082, %v4167_v29   ;;  %2880 = vmatpush3.bf16.msra.mxu1 %v2877_v42 }
  0xa0   :  { %2910 = vmatprep.subr.bf16.mxu0 %v2877_v42 }
  0xa1   :  { %600 = vmatmul.mubr.f32.gmra.mrb[22].mxu0 %v3829_v59  ;;  %3081 = vset.pattern.permute.xlu1 %v3213_v0 }
  0xa2   :  { %605 = vmatprep.mubr.f32.mxu0 %v3875_v16  ;;  %762 = vperm.xlu1 %3081, %v4167_v29   ;;  %v1076_v16 = vld [vmem:[#allocation2 + $0x28] sm:$0xff] }
  0xa3   :  { %3083 = vset.pattern.permute.xlu0 %v3213_v0  ;;  %v4195_v0 = vld [vmem:[%s4896_s1 + $0x38] sm:$0xff]  ;;  %2912 = vmatpush3.bf16.msra.mxu0 %v2877_v42 }
  0xa4   :  { %757 = vperm.xlu0 %3083, %v4159_v49  }
  0xa5   :  { %606 = vmatmul.mubr.f32.gmra.mrb[24].mxu0 %v3900_v28  ;;  %v2885_v28 = vpack.c.bf16 %v1076_v16, %v1075_v1 }
  0xa6   :  { %611 = vmatprep.mubr.f32.mxu0 %v3912_v33  ;;  %3084 = vset.pattern.permute.xlu1 %v3215_v62  ;;  %v1077_v33 = vld [vmem:[#allocation2 + $0x30] sm:$0xff] }
  0xa7   :  { %848 = vperm.xlu1 %3084, %v4159_v49  }
  0xa8   :  { %767 = vperm.xlu0 %3083, %v4186_v9  }
  0xa9   :  { %612 = vmatmul.mubr.f32.gmra.mrb[26].mxu0 %v3946_v52  ;;  %v1078_v52 = vld [vmem:[#allocation2 + $0x38] sm:$0xff] }
  0xaa   :  { %617 = vmatprep.mubr.f32.mxu0 %v3964_v60 }
  0xab   :  { %852 = vperm.xlu1 %3084, %v4167_v29  }
  0xac   :  { %772 = vperm.xlu0 %3083, %v4195_v0  }
  0xad   :  { %618 = vmatmul.mubr.f32.gmra.mrb[28].mxu0 %v3987_v8  ;;  %v2889_v8 = vpack.c.bf16 %v1078_v52, %v1077_v33 }
  0xae   :  { %623 = vmatprep.mubr.f32.mxu0 %v3999_v14  ;;  %v1079_v14 = vld [vmem:[#allocation2 + $0x40] sm:$0xff] }
  0xaf   :  { %3085 = vset.pattern.permute.xlu1 %v3214_v45 }
  0xb0   :  { %808 = vperm.xlu1 %3085, %v4186_v9   ;;  %3088 = vset.pattern.permute.xlu0 %v3218_v58 }
  0xb1   :  { %624 = vmatmul.mubr.f32.gmra.mrb[30].mxu0 %v4029_v30  ;;  %900 = vperm.xlu0 %3088, %v4167_v29   ;;  %v1080_v30 = vld [vmem:[#allocation2 + $0x48] sm:$0xff] }
  0xb2   :  { %v2893_v32 = vpack.c.bf16 %v1080_v30, %v1079_v14 }
  0xb4   :  { %3086 = vset.pattern.permute.xlu1 %v3218_v58 }
  0xb5   :  { %896 = vperm.xlu1 %3086, %v4159_v49   ;;  %3091 = vset.pattern.permute.xlu0 %v3215_v62  ;;  %v4213_v23 = vpop.permute.xlu1 %742 }
  0xb6   :  { %860 = vperm.xlu0 %3091, %v4195_v0  }
  0xb9   :  { %3087 = vset.pattern.permute.xlu1 %v3214_v45 }
  0xba   :  { %812 = vperm.xlu1 %3087, %v4195_v0   ;;  %3093 = vset.pattern.permute.xlu0 %v3217_v46  ;;  %v4220_v45 = vpop.permute.xlu1 %788 }
  0xbb   :  { %992 = vperm.xlu0 %3093, %v4159_v49   ;;  %v738_v55 = vpop.permute.xlu0 %737 }
  0xbe   :  { %3089 = vset.pattern.permute.xlu1 %v3215_v62  ;;  %v1073_v62 = vld [vmem:[#allocation2 + $0x10] sm:$0xff] }
  0xbf   :  { %856 = vperm.xlu1 %3089, %v4186_v9   ;;  %3095 = vset.pattern.permute.xlu0 %v3216_v36  ;;  %v2881_v54 = vpack.c.bf16 %v1074_v50, %v1073_v62  ;;  %v4225_v59 = vpop.permute.xlu1 %832 }
  0xc0   :  { %952 = vperm.xlu0 %3095, %v4186_v9  }
  0xc1   :  { %2882 = vmatprep.subr.bf16.mxu1 %v2881_v54  ;;  %2914 = vmatprep.subr.bf16.mxu0 %v2881_v54  ;;  %v785_v57 = vpop.permute.xlu0 %784 }
  0xc2   :  { %2884 = vmatpush3.bf16.msra.mxu1 %v2881_v54  ;;  %2916 = vmatpush3.bf16.msra.mxu0 %v2881_v54 }
  0xc3   :  { %3090 = vset.pattern.permute.xlu1 %v3216_v36  ;;  %2886 = vmatprep.subr.bf16.mxu1 %v2885_v28 }
  0xc4   :  { %944 = vperm.xlu1 %3090, %v4159_v49   ;;  %3098 = vset.pattern.permute.xlu0 %v3219_v21  ;;  %v4230_v60 = vpop.permute.xlu1 %747 }
  0xc5   :  { %1044 = vperm.xlu0 %3098, %v4167_v29   ;;  %2918 = vmatprep.subr.bf16.mxu0 %v2885_v28 }
  0xc6   :  { %2888 = vmatpush3.bf16.msra.mxu1 %v2885_v28  ;;  %2920 = vmatpush3.bf16.msra.mxu0 %v2885_v28  ;;  %v837_v63 = vpop.permute.xlu0 %836 }
  0xc7   :  { %2890 = vmatprep.subr.bf16.mxu1 %v2889_v8  ;;  %2922 = vmatprep.subr.bf16.mxu0 %v2889_v8 }
  0xc8   :  { %948 = vperm.xlu1 %3090, %v4167_v29  }
  0xc9   :  { %1048 = vperm.xlu0 %3098, %v4186_v9   ;;  %v4234_v34 = vpop.permute.xlu1 %792 }
  0xca   :  { %2892 = vmatpush3.bf16.msra.mxu1 %v2889_v8  ;;  %2924 = vmatpush3.bf16.msra.mxu0 %v2889_v8 }
  0xcb   :  { %2894 = vmatprep.subr.bf16.mxu1 %v2893_v32  ;;  %2926 = vmatprep.subr.bf16.mxu0 %v2893_v32 }
  0xcc   :  { %3092 = vset.pattern.permute.xlu1 %v3218_v58 }
  0xcd   :  { %904 = vperm.xlu1 %3092, %v4186_v9  }
  0xce   :  { %2896 = vmatpush3.bf16.msra.mxu1 %v2893_v32  ;;  %2928 = vmatpush3.bf16.msra.mxu0 %v2893_v32  ;;  %v4238_v37 = vpop.permute.xlu1 %752 }
  0xcf   :  { %2898 = vmatprep.subr.bf16.mxu1 %v2897_v41  ;;  %2930 = vmatprep.subr.bf16.mxu0 %v2897_v41 }
  0xd1   :  { %908 = vperm.xlu1 %3092, %v4195_v0  }
  0xd2   :  { %2900 = vmatpush3.bf16.msra.mxu1 %v2897_v41  ;;  %2932 = vmatpush3.bf16.msra.mxu0 %v2897_v41 }
  0xd3   :  { %v4242_v38 = vpop.permute.xlu1 %796 }
  0xd5   :  { %3094 = vset.pattern.permute.xlu1 %v3217_v46 }
  0xd6   :  { %996 = vperm.xlu1 %3094, %v4167_v29  }
  0xda   :  { %3096 = vset.pattern.permute.xlu1 %v3219_v21 }
  0xdb   :  { %1040 = vperm.xlu1 %3096, %v4159_v49  }
  0xdf   :  { %3097 = vset.pattern.permute.xlu1 %v3216_v36  ;;  %v2901_v36 = vpack.c.bf16 %v1084_v47, %v1083_v44 }
  0xe0   :  { %956 = vperm.xlu1 %3097, %v4195_v0  }
  0xe1   :  { %2902 = vmatprep.subr.bf16.mxu1 %v2901_v36  ;;  %2934 = vmatprep.subr.bf16.mxu0 %v2901_v36 }
  0xe2   :  { %2904 = vmatpush3.bf16.msra.mxu1 %v2901_v36  ;;  %2936 = vmatpush3.bf16.msra.mxu0 %v2901_v36 }
  0xe4   :  { %3099 = vset.pattern.permute.xlu1 %v3217_v46  ;;  %v1085_v46 = vld [vmem:[#allocation2 + $0x70] sm:$0xff] }
  0xe5   :  { %1000 = vperm.xlu1 %3099, %v4186_v9   ;;  %v4246_v43 = vpop.permute.xlu1 %840  ;;  %v2905_v53 = vpack.c.bf16 %v1086_v51, %v1085_v46 }
  0xe7   :  { %2906 = vmatprep.subr.bf16.mxu1 %v2905_v53  ;;  %2938 = vmatprep.subr.bf16.mxu0 %v2905_v53 }
  0xe8   :  { %2908 = vmatpush3.bf16.msra.mxu1 %v2905_v53  ;;  %2940 = vmatpush3.bf16.msra.mxu0 %v2905_v53 }
  0xe9   :  { %1004 = vperm.xlu1 %3099, %v4195_v0   ;;  %v4249_v48 = vpop.permute.xlu1 %844 }
  0xed   :  { %3100 = vset.pattern.permute.xlu1 %v3219_v21 }
  0xee   :  { %1052 = vperm.xlu1 %3100, %v4195_v0  }
  0xf0   :  { %v4253_v56 = vpop.permute.xlu1 %932 }
  0xf6   :  { %v4255_v58 = vpop.permute.xlu1 %976 }
  0xfb   :  { %v4257_v61 = vpop.permute.xlu1 %892 }
  0xfd   :  { %v881_v13 = vpop.permute.xlu0 %880 }
 0x100   :  { %v4259_v2 = vpop.permute.xlu1 %936 }
 0x101   :  { %v885_v4 = vpop.permute.xlu0 %884 }
 0x105   :  { %v4261_v3 = vpop.permute.xlu1 %1024 }
 0x106   :  { %v889_v6 = vpop.permute.xlu0 %888 }
 0x109   :  { %v4263_v5 = vpop.permute.xlu1 %1028 }
 0x10b   :  { %v4267_v10 = vpop.permute.xlu0 %928 }
 0x10e   :  { %v4265_v7 = vpop.permute.xlu1 %984 }
 0x10f   :  { %v4273_v15 = vpop.permute.xlu0 %940 }
 0x113   :  { %v4269_v11 = vpop.permute.xlu1 %1032 }
 0x115   :  { %v4277_v18 = vpop.permute.xlu0 %980 }
 0x117   :  { %v4271_v12 = vpop.permute.xlu1 %1036 }
 0x119   :  { %v4281_v20 = vpop.permute.xlu0 %988 }
 0x11c   :  { %v4275_v17 = vpop.permute.xlu1 %800 }
 0x11e   :  { %v4284_v54 = vpop.permute.xlu0 %804 }
 0x121   :  { %v4279_v19 = vpop.permute.xlu1 %762 }
 0x126   :  { %v849_v26 = vpop.permute.xlu1 %848 }
 0x128   :  { %v357_v21 = vpop.f32.mrb[0].mxu0 }
 0x129   :  { %v775_v22 = vmul.f32 %v738_v55, %v357_v21  ;;  %v359_v24 = vpop.f32.mrb[1].mxu0 }
 0x12a   :  { %v815_v27 = vmul.f32 %v785_v57, %v359_v24  ;;  %v470_v31 = vpop.f32.mrb[0].mxu1  ;;  %v853_v28 = vpop.permute.xlu1 %852 }
 0x12b   :  { %v863_v25 = vmul.f32 %v4225_v59, %v470_v31  ;;  %v472_v35 = vpop.f32.mrb[1].mxu1 }
 0x12c   :  { %v823_v42 = vadd.f32 %v815_v27, %v775_v22  ;;  %v363_v62 = vpop.f32.mrb[2].mxu0  ;;  %v911_v50 = vmul.f32 %v881_v13, %v472_v35 }
 0x12d   :  { %v776_v1 = vmul.f32 %v4213_v23, %v363_v62  ;;  %v365_v16 = vpop.f32.mrb[3].mxu0 }
 0x12e   :  { %v871_v33 = vadd.f32 %v863_v25, %v823_v42  ;;  %v816_v52 = vmul.f32 %v4220_v45, %v365_v16  ;;  %v476_v8 = vpop.f32.mrb[2].mxu1  ;;  %v758_v45 = vpop.permute.xlu0 %757 }
 0x12f   :  { %v864_v14 = vmul.f32 %v837_v63, %v476_v8  ;;  %v478_v30 = vpop.f32.mrb[3].mxu1  ;;  %v809_v46 = vpop.permute.xlu1 %808 }
 0x130   :  { %v824_v32 = vadd.f32 %v816_v52, %v776_v1  ;;  %v4288_v39 = vadd.f32 %v911_v50, %v871_v33  ;;  %v912_v59 = vmul.f32 %v885_v4, %v478_v30  ;;  %v369_v40 = vpop.f32.mrb[4].mxu0 }
 0x131   :  { %v777_v41 = vmul.f32 %v4230_v60, %v369_v40  ;;  %v371_v44 = vpop.f32.mrb[5].mxu0 }
 0x132   :  { %v872_v47 = vadd.f32 %v864_v14, %v824_v32  ;;  %v817_v36 = vmul.f32 %v4234_v34, %v371_v44  ;;  %v482_v23 = vpop.f32.mrb[4].mxu1  ;;  %v768_v42 = vpop.permute.xlu0 %767 }
 0x133   :  { %v865_v51 = vmul.f32 %v4246_v43, %v482_v23  ;;  %v484_v53 = vpop.f32.mrb[5].mxu1 }
 0x134   :  { %v4293_v55 = vadd.f32 %v912_v59, %v872_v47  ;;  %v825_v57 = vadd.f32 %v817_v36, %v777_v41  ;;  %v913_v63 = vmul.f32 %v889_v6, %v484_v53  ;;  %v375_v13 = vpop.f32.mrb[6].mxu0  ;;  %v897_v31 = vpop.permute.xlu1 %896 }
 0x135   :  { %v778_v4 = vmul.f32 %v4238_v37, %v375_v13  ;;  %v377_v21 = vpop.f32.mrb[7].mxu0 }
 0x136   :  { %v873_v22 = vadd.f32 %v865_v51, %v825_v57  ;;  %v818_v60 = vmul.f32 %v4242_v38, %v377_v21  ;;  %v488_v24 = vpop.f32.mrb[6].mxu1  ;;  %v773_v33 = vpop.permute.xlu0 %772 }
 0x137   :  { %v866_v34 = vmul.f32 %v4249_v48, %v488_v24  ;;  %v490_v27 = vpop.f32.mrb[7].mxu1 }
 0x138   :  { %v4298_v25 = vadd.f32 %v913_v63, %v873_v22  ;;  %v826_v43 = vadd.f32 %v818_v60, %v778_v4  ;;  %v914_v35 = vmul.f32 %v4257_v61, %v490_v27 }
 0x139   :  { %v813_v37 = vpop.permute.xlu1 %812 }
 0x13a   :  { %v874_v62 = vadd.f32 %v866_v34, %v826_v43  ;;  %v494_v6 = vpop.f32.mrb[8].mxu1 }
 0x13b   :  { %v496_v50 = vpop.f32.mrb[9].mxu1  ;;  %v867_v30 = vmul.f32 %v849_v26, %v494_v6 }
 0x13c   :  { %v4301_v1 = vadd.f32 %v914_v35, %v874_v62  ;;  %v381_v16 = vpop.f32.mrb[8].mxu0  ;;  %v915_v40 = vmul.f32 %v897_v31, %v496_v50 }
 0x13d   :  { %v779_v38 = vmul.f32 %v758_v45, %v381_v16  ;;  %v383_v52 = vpop.f32.mrb[9].mxu0  ;;  %v901_v45 = vpop.permute.xlu0 %900 }
 0x13e   :  { %v500_v8 = vpop.f32.mrb[10].mxu1  ;;  %v857_v48 = vpop.permute.xlu1 %856  ;;  %v819_v14 = vmul.f32 %v4275_v17, %v383_v52 }
 0x13f   :  { %v502_v32 = vpop.f32.mrb[11].mxu1  ;;  %v868_v63 = vmul.f32 %v853_v28, %v500_v8 }
 0x140   :  { %v827_v59 = vadd.f32 %v819_v14, %v779_v38  ;;  %v916_v4 = vmul.f32 %v901_v45, %v502_v32 }
 0x141   :  { %v861_v43 = vpop.permute.xlu0 %860 }
 0x142   :  { %v506_v61 = vpop.f32.mrb[12].mxu1  ;;  %v875_v41 = vadd.f32 %v867_v30, %v827_v59 }
 0x143   :  { %v508_v44 = vpop.f32.mrb[13].mxu1  ;;  %v387_v47 = vpop.f32.mrb[10].mxu0  ;;  %v869_v31 = vmul.f32 %v857_v48, %v506_v61 }
 0x144   :  { %v4304_v36 = vpop.permute.xlu1 %944  ;;  %v780_v23 = vmul.f32 %v4279_v19, %v387_v47  ;;  %v389_v51 = vpop.f32.mrb[11].mxu0  ;;  %v4307_v53 = vadd.f32 %v915_v40, %v875_v41 }
 0x145   :  { %v820_v57 = vmul.f32 %v4284_v54, %v389_v51 }
 0x146   :  { %v512_v17 = vpop.f32.mrb[14].mxu1 }
 0x147   :  { %v828_v26 = vadd.f32 %v820_v57, %v780_v23  ;;  %v514_v21 = vpop.f32.mrb[15].mxu1  ;;  %v393_v22 = vpop.f32.mrb[12].mxu0  ;;  %v870_v14 = vmul.f32 %v861_v43, %v512_v17 }
 0x148   :  { %v4310_v13 = vpop.permute.xlu1 %948  ;;  %v781_v24 = vmul.f32 %v768_v42, %v393_v22  ;;  %v395_v34 = vpop.f32.mrb[13].mxu0 }
 0x149   :  { %v876_v60 = vadd.f32 %v868_v63, %v828_v26  ;;  %v821_v27 = vmul.f32 %v809_v46, %v395_v34 }
 0x14b   :  { %v4312_v19 = vadd.f32 %v916_v4, %v876_v60  ;;  %v829_v35 = vadd.f32 %v821_v27, %v781_v24  ;;  %v2427_v16 = vpop.f32.mrb[16].mxu1 }
 0x14c   :  { %v399_v62 = vpop.f32.mrb[14].mxu0  ;;  %v905_v6 = vpop.permute.xlu1 %904 }
 0x14d   :  { %v782_v54 = vmul.f32 %v773_v33, %v399_v62  ;;  %v917_v28 = vmul.f32 %v905_v6, %v508_v44  ;;  %v401_v50 = vpop.f32.mrb[15].mxu0  ;;  %v877_v38 = vadd.f32 %v869_v31, %v829_v35  ;;  %v2428_v8 = vpop.f32.mrb[17].mxu1 }
 0x14e   :  { %v822_v52 = vmul.f32 %v813_v37, %v401_v50  ;;  %v2429_v30 = vadd.f32 %v2428_v8, %v2427_v16 }
 0x14f   :  { %v4314_v32 = vadd.f32 %v917_v28, %v877_v38  ;;  %v2430_v46 = vpop.f32.mrb[18].mxu1 }
 0x150   :  { %v830_v42 = vadd.f32 %v822_v52, %v782_v54  ;;  %v909_v48 = vpop.permute.xlu1 %908  ;;  %v2431_v59 = vpop.f32.mrb[19].mxu1  ;;  %v1055_v16 = vmul.f32 %v2429_v30, %v4261_v3 }
 0x151   :  { %v918_v40 = vmul.f32 %v909_v48, %v514_v21  ;;  %v2432_v41 = vadd.f32 %v2431_v59, %v2430_v46 }
 0x152   :  { %v878_v61 = vadd.f32 %v870_v14, %v830_v42  ;;  %v993_v42 = vpop.permute.xlu0 %992 }
 0x153   :  { %v2433_v33 = vpop.f32.mrb[20].mxu1  ;;  %v1056_v48 = vmul.f32 %v2432_v41, %v4263_v5 }
 0x154   :  { %v4316_v47 = vadd.f32 %v918_v40, %v878_v61  ;;  %v2434_v44 = vpop.f32.mrb[21].mxu1 }
 0x155   :  { %v2435_v23 = vadd.f32 %v2434_v44, %v2433_v33  ;;  %v4318_v22 = vpop.permute.xlu1 %996 }
 0x156   :  { %v953_v41 = vpop.permute.xlu0 %952 }
 0x157   :  { %v2436_v51 = vpop.f32.mrb[22].mxu1  ;;  %v1057_v33 = vmul.f32 %v2435_v23, %v4269_v11 }
 0x158   :  { %v2437_v45 = vpop.f32.mrb[23].mxu1 }
 0x159   :  { %v2438_v37 = vadd.f32 %v2437_v45, %v2436_v51 }
 0x15a   :  { %v1041_v6 = vpop.permute.xlu1 %1040 }
 0x15b   :  { %v2439_v57 = vpop.f32.mrb[24].mxu1 }
 0x15c   :  { %v2440_v63 = vpop.f32.mrb[25].mxu1 }
 0x15d   :  { %v2441_v17 = vadd.f32 %v2440_v63, %v2439_v57  ;;  %v1058_v63 = vmul.f32 %v2438_v37, %v4271_v12 }
 0x15f   :  { %v2442_v26 = vpop.f32.mrb[26].mxu1 }
 0x160   :  { %v2443_v4 = vpop.f32.mrb[27].mxu1 }
 0x161   :  { %v4320_v60 = vadd.f32 %v2443_v4, %v2442_v26 }
 0x163   :  { %v2445_v21 = vpop.f32.mrb[28].mxu1 }
 0x164   :  { %v2446_v34 = vpop.f32.mrb[29].mxu1 }
 0x165   :  { %v4323_v43 = vadd.f32 %v2446_v34, %v2445_v21  ;;  %v1059_v34 = vmul.f32 %v2441_v17, %v1041_v6 }
 0x168   :  { %v583_v24 = vpop.f32.mrb[16].mxu0  ;;  %v2448_v54 = vpop.f32.mrb[30].mxu1 }
 0x169   :  { %v959_v27 = vmul.f32 %v4267_v10, %v583_v24  ;;  %v585_v31 = vpop.f32.mrb[17].mxu0  ;;  %v2449_v50 = vpop.f32.mrb[31].mxu1 }
 0x16a   :  { %v1007_v35 = vmul.f32 %v4255_v58, %v585_v31  ;;  %v4329_v14 = vadd.f32 %v2449_v50, %v2448_v54 }
 0x16b   :  { %v967_v62 = vadd.f32 %v959_v27, %v4288_v39 }
 0x16c   :  { %v589_v28 = vpop.f32.mrb[18].mxu0 }
 0x16d   :  { %v1015_v38 = vadd.f32 %v1007_v35, %v967_v62  ;;  %v960_v52 = vmul.f32 %v4253_v56, %v589_v28  ;;  %v591_v8 = vpop.f32.mrb[19].mxu0 }
 0x16e   :  { %v1008_v10 = vmul.f32 %v4277_v18, %v591_v8  ;;  %v957_v18 = vpop.permute.xlu1 %956 }
 0x16f   :  { %v968_v46 = vadd.f32 %v960_v52, %v4293_v55  ;;  %v4333_v58 = vadd.f32 %v1055_v16, %v1015_v38 }
 0x170   :  { %v595_v39 = vpop.f32.mrb[20].mxu0 }
 0x171   :  { %v1016_v59 = vadd.f32 %v1008_v10, %v968_v46  ;;  %v961_v40 = vmul.f32 %v4259_v2, %v595_v39  ;;  %v597_v3 = vpop.f32.mrb[21].mxu0  ;;  %2555 = vmatprep.mubr.f32.mxu1 %v4333_v58  ;;  %v1192_v56 = vmul.f32 %v4333_v58, %v4333_v58 }
 0x172   :  { %v1009_v30 = vmul.f32 %v4265_v7, %v597_v3  ;;  %v1001_v23 = vpop.permute.xlu1 %1000 }
 0x173   :  { %v4341_v61 = vadd.f32 %v1056_v48, %v1016_v59  ;;  %v969_v55 = vadd.f32 %v961_v40, %v4298_v25  ;;  %2599 = vmatprep.mubr.f32.mxu0 %v1192_v56 }
 0x174   :  { %v601_v5 = vpop.f32.mrb[22].mxu0 }
 0x175   :  { %v1193_v2 = vmul.f32 %v4341_v61, %v4341_v61  ;;  %v1017_v44 = vadd.f32 %v1009_v30, %v969_v55  ;;  %v962_v51 = vmul.f32 %v4273_v15, %v601_v5  ;;  %v603_v45 = vpop.f32.mrb[23].mxu0  ;;  %2556 = vmatmul.mubr.f32.vlgmr.msra.gmra.mrb[32].mxu1 %v4341_v61 }
 0x176   :  { %v1010_v7 = vmul.f32 %v4281_v20, %v603_v45  ;;  %v1045_v20 = vpop.permute.xlu0 %1044  ;;  %v1005_v54 = vpop.permute.xlu1 %1004 }
 0x177   :  { %v970_v57 = vadd.f32 %v962_v51, %v4301_v1  ;;  %2600 = vmatmul.mubr.f32.vlgmr.msra.gmra.mrb[32].mxu0 %v1193_v2  ;;  %v4351_v25 = vadd.f32 %v1057_v33, %v1017_v44  ;;  %v4396_v2 = vld [vmem:[%s4901_s6] sm:$0xff] }
 0x178   :  { %v607_v11 = vpop.f32.mrb[24].mxu0 }
 0x179   :  { %v1018_v26 = vadd.f32 %v1010_v7, %v970_v57  ;;  %v963_v4 = vmul.f32 %v4304_v36, %v607_v11  ;;  %2558 = vmatprep.mubr.f32.mxu1 %v4351_v25  ;;  %v609_v15 = vpop.f32.mrb[25].mxu0  ;;  %v1194_v21 = vmul.f32 %v4351_v25, %v4351_v25 }
 0x17a   :  { %v1011_v24 = vmul.f32 %v993_v42, %v609_v15  ;;  %v1049_v50 = vpop.permute.xlu0 %1048  ;;  %v1053_v42 = vpop.permute.xlu1 %1052 }
 0x17b   :  { %v971_v1 = vadd.f32 %v963_v4, %v4307_v53  ;;  %2602 = vmatprep.mubr.f32.mxu0 %v1194_v21  ;;  %v4359_v27 = vadd.f32 %v1058_v63, %v1018_v26  ;;  %v1060_v53 = vmul.f32 %v4320_v60, %v1045_v20  ;;  %v1061_v60 = vmul.f32 %v4323_v43, %v1049_v50 }
 0x17c   :  { %v613_v31 = vpop.f32.mrb[26].mxu0 }
 0x17d   :  { %v1019_v35 = vadd.f32 %v1011_v24, %v971_v1  ;;  %v964_v12 = vmul.f32 %v4310_v13, %v613_v31  ;;  %2559 = vmatmul.mubr.f32.gmra.mrb[34].mxu1 %v4359_v27  ;;  %v615_v36 = vpop.f32.mrb[27].mxu0  ;;  %v1195_v37 = vmul.f32 %v4359_v27, %v4359_v27 }
 0x17e   :  { %v1012_v62 = vmul.f32 %v4318_v22, %v615_v36 }
 0x17f   :  { %v972_v28 = vadd.f32 %v964_v12, %v4312_v19  ;;  %2603 = vmatmul.mubr.f32.gmra.mrb[34].mxu0 %v1195_v37  ;;  %v4368_v17 = vadd.f32 %v1059_v34, %v1019_v35 }
 0x180   :  { %v619_v6 = vpop.f32.mrb[28].mxu0 }
 0x181   :  { %v1020_v16 = vadd.f32 %v1012_v62, %v972_v28  ;;  %v965_v13 = vmul.f32 %v953_v41, %v619_v6  ;;  %2561 = vmatprep.mubr.f32.mxu1 %v4368_v17  ;;  %v621_v38 = vpop.f32.mrb[29].mxu0  ;;  %v1196_v52 = vmul.f32 %v4368_v17, %v4368_v17 }
 0x182   :  { %v1013_v8 = vmul.f32 %v1001_v23, %v621_v38 }
 0x183   :  { %v4373_v22 = vadd.f32 %v1060_v53, %v1020_v16  ;;  %v973_v19 = vadd.f32 %v965_v13, %v4314_v32  ;;  %2605 = vmatprep.mubr.f32.mxu0 %v1196_v52  ;;  %v1062_v32 = vmul.f32 %v4329_v14, %v1053_v42  ;;  %v1347_v16 = vld [vmem:[%s4901_s6 + $0x8] sm:$0xff] }
 0x184   :  { %v625_v10 = vpop.f32.mrb[30].mxu0 }
 0x185   :  { %v1021_v46 = vadd.f32 %v1013_v8, %v973_v19  ;;  %v966_v39 = vmul.f32 %v957_v18, %v625_v10  ;;  %2562 = vmatmul.mubr.f32.gmra.mrb[36].mxu1 %v4373_v22  ;;  %v627_v48 = vpop.f32.mrb[31].mxu0  ;;  %v1197_v59 = vmul.f32 %v4373_v22, %v4373_v22  ;;  %v1450_v19 = vld [vmem:[%s4902_s7] sm:$0xff] }
 0x186   :  { %v1014_v40 = vmul.f32 %v1005_v54, %v627_v48 }
 0x187   :  { %v4380_v3 = vadd.f32 %v1061_v60, %v1021_v46  ;;  %v974_v56 = vadd.f32 %v966_v39, %v4316_v47  ;;  %2606 = vmatmul.mubr.f32.gmra.mrb[36].mxu0 %v1197_v59 }
 0x189   :  { %v1022_v30 = vadd.f32 %v1014_v40, %v974_v56  ;;  %2564 = vmatprep.mubr.f32.mxu1 %v4380_v3  ;;  %v1198_v43 = vmul.f32 %v4380_v3, %v4380_v3 }
 0x18b   :  { %v4387_v18 = vadd.f32 %v1062_v32, %v1022_v30  ;;  %2608 = vmatprep.mubr.f32.mxu0 %v1198_v43 }
 0x18d   :  { %2565 = vmatmul.mubr.f32.gmra.mrb[38].mxu1 %v4387_v18  ;;  %v1199_v55 = vmul.f32 %v4387_v18, %v4387_v18 }
 0x18e   :  { %2619 = vmatprep.mubr.msk.f32.mxu1 %vm1348_vm0, %v4396_v2 }
 0x18f   :  { %2609 = vmatmul.mubr.f32.gmra.mrb[38].mxu0 %v1199_v55 }
 0x248   :  { %v2557_v33 = vpop.f32.mrb[32].mxu1 }
 0x249   :  { %v1153_v47 = vpop.f32.mrb[33].mxu1 }
 0x24a   :  { %v2601_v5 = vpop.f32.mrb[32].mxu0 }
 0x24b   :  { %v1266_v41 = vpop.f32.mrb[33].mxu0 }
 0x24c   :  { %v3101_v14 = vpack.i.bf16 %v2601_v5, %v1266_v41 }
 0x24e   :  { %3102 = vrot.lane.b32.xlu0 %v3101_v14, %s3220_s30 }
 0x250   :  { %v2560_v44 = vpop.f32.mrb[34].mxu1 }
 0x251   :  { %v1163_v51 = vpop.f32.mrb[35].mxu1 }
 0x252   :  { %v2604_v45 = vpop.f32.mrb[34].mxu0 }
 0x253   :  { %v1276_v7 = vpop.f32.mrb[35].mxu0 }
 0x254   :  { %v3106_v57 = vpack.i.bf16 %v2604_v45, %v1276_v7 }
 0x256   :  { %3107 = vrot.lane.b32.xlu1 %v3106_v57, %s3220_s30 }
 0x258   :  { %v2563_v11 = vpop.f32.mrb[36].mxu1 }
 0x259   :  { %v1173_v23 = vpop.f32.mrb[37].mxu1 }
 0x25a   :  { %v2607_v63 = vpop.f32.mrb[36].mxu0 }
 0x25b   :  { %v1286_v26 = vpop.f32.mrb[37].mxu0 }
 0x25c   :  { %v3111_v4 = vpack.i.bf16 %v2607_v63, %v1286_v26 }
 0x260   :  { %v2566_v15 = vpop.f32.mrb[38].mxu1 }
 0x261   :  { %v1183_v21 = vpop.f32.mrb[39].mxu1 }
 0x262   :  { %v2610_v24 = vpop.f32.mrb[38].mxu0 }
 0x263   :  { %v1296_v20 = vpop.f32.mrb[39].mxu0 }
 0x264   :  { %v3116_v1 = vpack.i.bf16 %v2610_v24, %v1296_v20 }
 0x2c0   :  { %v3103_v34 = vpop.permute.xlu0 %3102 }
 0x2c1   :  { %v3105_v31 = vunpack.i.h.bf16 %v3103_v34  ;;  %v3104_v35 = vunpack.i.l.bf16 %v3103_v34 }
 0x2c3   :  { %v1338_v12 = vsel %vm1337_vm1, %v1153_v47, %v3104_v35  ;;  %v1339_v36 = vsel %vm1337_vm1, %v2557_v33, %v3105_v31 }
 0x2c4   :  { %v2941_v37 = vpack.c.bf16 %v1339_v36, %v1338_v12  ;;  %v3222_v12 = vmov 7   ;;  %v3166_v36 = vld [vmem:[%s4896_s1 + $0x8] sm:$0xff] }
 0x2c5   :  { %3122 = vset.pattern.permute.xlu1 %v3222_v12  ;;  %3121 = vset.pattern.permute.xlu0 %v3222_v12  ;;  %v2045_v12 = vld [vmem:[%s4900_s5 + $0xb8] sm:$0xff] }
 0x2c6   :  { %2942 = vmatprep.subr.bf16.mxu1 %v2941_v37 }
 0x2c7   :  { %2944 = vmatpush3.bf16.msra.mxu1 %v2941_v37  ;;  %v3167_v37 = vld [vmem:[%s4896_s1] sm:$0xff] }
 0x2c8   :  { %v3108_v62 = vpop.permute.xlu1 %3107 }
 0x2c9   :  { %v3110_v54 = vunpack.i.h.bf16 %v3108_v62  ;;  %v3109_v28 = vunpack.i.l.bf16 %v3108_v62  ;;  %v3223_v62 = vmov 8  }
 0x2cb   :  { %v1340_v53 = vsel %vm1337_vm1, %v1163_v51, %v3109_v28  ;;  %v1341_v6 = vsel %vm1337_vm1, %v2560_v44, %v3110_v54  ;;  %v3168_v54 = vld [vmem:[%s4896_s1 + $0x10] sm:$0xff]  ;;  %v3169_v28 = vld [vmem:[%s4896_s1 + $0x18] sm:$0xff] }
 0x2cc   :  { %v2945_v50 = vpack.c.bf16 %v1341_v6, %v1340_v53 }
 0x2ce   :  { %2946 = vmatprep.subr.bf16.mxu1 %v2945_v50 }
 0x2cf   :  { %2948 = vmatpush3.bf16.msra.mxu1 %v2945_v50 }
 0x2d2   :  { %2620 = vmatmul.mubr.msk.f32.vlgmr.msra.gmra.mrb[40].mxu1 %vm1348_vm0, %v1347_v16 }
 0x2d3   :  { %2626 = vmatprep.mubr.msk.f32.mxu1 %vm1454_vm2, %v1450_v19 }
 0x3a5   :  { %v2621_v13 = vpop.f32.mrb[40].mxu1 }
 0x3a6   :  { %v1431_v38 = vmul.f32 %v2621_v13, %v2621_v13  ;;  %v1421_v52 = vpop.f32.mrb[41].mxu1 }
 0x3a7   :  { %v1430_v8 = vmul.f32 %v1421_v52, %v1421_v52 }
 0x3a8   :  { %1436 = vrot.lane.b32.xlu1 %v1431_v38, %s3220_s30 }
 0x3a9   :  { %1434 = vrot.lane.b32.xlu0 %v1430_v8, %s3220_s30 }
 0x3ac   :  { %3117 = vrot.lane.b32.xlu1 %v3116_v1, %s3220_s30 }
 0x3ad   :  { %3112 = vrot.lane.b32.xlu0 %v3111_v4, %s3220_s30  ;;  %v4426_v4 = vld [vmem:[%s4902_s7 + $0x8] sm:$0xff] }
 0x41a   :  { %v1437_v60 = vpop.permute.xlu1 %1436 }
 0x41b   :  { %v1441_v10 = vsub.f32 %v2621_v13, %v1437_v60  ;;  %v1435_v42 = vpop.permute.xlu0 %1434 }
 0x41c   :  { %v1440_v46 = vsub.f32 %v1421_v52, %v1435_v42  ;;  %v2023_v42 = vld [vmem:[%s4900_s5 + $0x8] sm:$0xff] }
 0x41d   :  { %v1443_v39 = vmax.f32 %v1441_v10, 0.0 }
 0x41e   :  { %v1442_v48 = vmax.f32 %v1440_v46, 0.0  ;;  %v3118_v59 = vpop.permute.xlu1 %3117  ;;  %v2027_v46 = vld [vmem:[%s4900_s5 + $0x28] sm:$0xff] }
 0x41f   :  { %v1445_v40 = vadd.f32 1e-05, %v1443_v39  ;;  %v3120_v56 = vunpack.i.h.bf16 %v3118_v59  ;;  %v3119_v32 = vunpack.i.l.bf16 %v3118_v59  ;;  %v3113_v30 = vpop.permute.xlu0 %3112  ;;  %v2965_v39 = vpack.c.bf16 %v2027_v46, %v2023_v42  ;;  %v2026_v59 = vld [vmem:[%s4900_s5 + $0x20] sm:$0xff]  ;;  %v2067_v42 = vld [vmem:[%s4900_s5 + $0x168] sm:$0xff]  ;;  %v2057_v46 = vld [vmem:[%s4900_s5 + $0x118] sm:$0xff] }
 0x420   :  { %v1444_v43 = vadd.f32 1e-05, %v1442_v48  ;;  %v3115_v55 = vunpack.i.h.bf16 %v3113_v30  ;;  %v3114_v33 = vunpack.i.l.bf16 %v3113_v30  ;;  %v2022_v48 = vld [vmem:[%s4900_s5] sm:$0xff]  ;;  %v2025_v30 = vld [vmem:[%s4900_s5 + $0x18] sm:$0xff] }
 0x421   :  { %3126 = vrsqrt.f32 %v1445_v40  ;;  %v1344_v47 = vsel %vm1337_vm1, %v1183_v21, %v3119_v32  ;;  %v1345_v5 = vsel %vm1337_vm1, %v2566_v15, %v3120_v56  ;;  %v2967_v40 = vpack.c.bf16 %v2026_v59, %v2022_v48  ;;  %2966 = vmatprep.subr.bf16.mxu0 %v2965_v39  ;;  %v2031_v56 = vld [vmem:[%s4900_s5 + $0x48] sm:$0xff]  ;;  %v2061_v48 = vld [vmem:[%s4900_s5 + $0x138] sm:$0xff]  ;;  %v2062_v59 = vld [vmem:[%s4900_s5 + $0x140] sm:$0xff] }
 0x422   :  { %3128 = vrsqrt.f32 %v1444_v43  ;;  %v1342_v41 = vsel %vm1337_vm1, %v1173_v23, %v3114_v33  ;;  %v1343_v14 = vsel %vm1337_vm1, %v2563_v11, %v3115_v55  ;;  %v2957_v44 = vpack.c.bf16 %v1345_v5, %v1344_v47  ;;  %v4431_v11 = vld [vmem:[%s4902_s7 + $0x10] sm:$0xff]  ;;  %v4440_v23 = vld [vmem:[%s4902_s7 + $0x18] sm:$0xff]  ;;  %v2035_v32 = vld [vmem:[%s4900_s5 + $0x68] sm:$0xff] }
 0x423   :  { %v2953_v51 = vpack.c.bf16 %v1343_v14, %v1342_v41  ;;  %2968 = vmatpush1.bf16.msra.mxu0 %v2967_v40  ;;  %v2969_v43 = vpack.c.bf16 %v2035_v32, %v2031_v56  ;;  %v2029_v55 = vld [vmem:[%s4900_s5 + $0x38] sm:$0xff]  ;;  %v2030_v33 = vld [vmem:[%s4900_s5 + $0x40] sm:$0xff]  ;;  %v2024_v14 = vld [vmem:[%s4900_s5 + $0x10] sm:$0xff]  ;;  %v4653_v56 = vpack.c.bf16 %v2061_v48, %v2057_v46 }
 0x424   :  { %v2034_v47 = vld [vmem:[%s4900_s5 + $0x60] sm:$0xff]  ;;  %v4533_v5 = vpack.c.bf16 %v2029_v55, %v2025_v30  ;;  %v2056_v30 = vld [vmem:[%s4900_s5 + $0x110] sm:$0xff] }
 0x425   :  { %v2971_v41 = vpack.c.bf16 %v2034_v47, %v2030_v33  ;;  %2970 = vmatprep.subr.bf16.mxu0 %v2969_v43  ;;  %v2066_v40 = vld [vmem:[%s4900_s5 + $0x160] sm:$0xff]  ;;  %v2060_v43 = vld [vmem:[%s4900_s5 + $0x130] sm:$0xff]  ;;  %v2071_v33 = vld [vmem:[%s4900_s5 + $0x188] sm:$0xff] }
 0x426   :  { %v2987_v32 = vpack.c.bf16 %v2066_v40, %v2062_v59  ;;  %v4661_v55 = vpack.c.bf16 %v2060_v43, %v2056_v30  ;;  %v2075_v47 = vld [vmem:[%s4900_s5 + $0x1a8] sm:$0xff] }
 0x427   :  { %2972 = vmatpush1.bf16.msra.mxu0 %v2971_v41  ;;  %v2065_v41 = vld [vmem:[%s4900_s5 + $0x158] sm:$0xff] }
 0x42b   :  { %v3127_v45 = vpop.eup %3126 }
 0x42c   :  { %v3129_v7 = vpop.eup %3128  ;;  %v1449_v57 = vsel %vm1337_vm1, %v2621_v13, %v3127_v45  ;;  %v2039_v45 = vld [vmem:[%s4900_s5 + $0x88] sm:$0xff] }
 0x42d   :  { %v1448_v63 = vsel %vm1337_vm1, %v1421_v52, %v3129_v7  ;;  %v2043_v7 = vld [vmem:[%s4900_s5 + $0xa8] sm:$0xff] }
 0x42e   :  { %v2949_v26 = vpack.c.bf16 %v1449_v57, %v1448_v63  ;;  %v2033_v57 = vld [vmem:[%s4900_s5 + $0x58] sm:$0xff]  ;;  %v2973_v63 = vpack.c.bf16 %v2043_v7, %v2039_v45  ;;  %v2070_v45 = vld [vmem:[%s4900_s5 + $0x180] sm:$0xff] }
 0x42f   :  { %v2074_v7 = vld [vmem:[%s4900_s5 + $0x1a0] sm:$0xff] }
 0x430   :  { %2950 = vmatprep.subr.bf16.mxu1 %v2949_v26  ;;  %2974 = vmatprep.subr.bf16.mxu0 %v2973_v63  ;;  %v2991_v63 = vpack.c.bf16 %v2074_v7, %v2070_v45 }
 0x431   :  { %2952 = vmatpush3.bf16.msra.mxu1 %v2949_v26  ;;  %v2037_v26 = vld [vmem:[%s4900_s5 + $0x78] sm:$0xff] }
 0x432   :  { %2954 = vmatprep.subr.bf16.mxu1 %v2953_v51 }
 0x434   :  { %2627 = vmatmul.mubr.msk.f32.vlgmr.msra.gmra.mrb[42].mxu1 %vm1454_vm2, %v4426_v4 }
 0x435   :  { %2956 = vmatpush3.bf16.msra.mxu1 %v2953_v51  ;;  %2629 = vmatprep.mubr.msk.f32.mxu1 %vm1454_vm2, %v4431_v11 }
 0x436   :  { %2958 = vmatprep.subr.bf16.mxu1 %v2957_v44 }
 0x438   :  { %2630 = vmatmul.mubr.msk.f32.gmra.mrb[44].mxu1 %vm1454_vm2, %v4440_v23 }
 0x439   :  { %2960 = vmatpush3.bf16.msra.mxu1 %v2957_v44  ;;  %2640 = vmatprep.mubr.msk.f32.mxu1 %vm1348_vm0, %v4396_v2  ;;  %v3221_v2 = vmov 0.0   ;;  %v2028_v44 = vld [vmem:[%s4900_s5 + $0x30] sm:$0xff] }
 0x43a   :  { %2150 = vmatprep.mubr.f32.mxu0 %v3221_v2  ;;  %v4541_v51 = vpack.c.bf16 %v2028_v44, %v2024_v14  ;;  %v2989_v14 = vpack.c.bf16 %v2075_v47, %v2071_v33  ;;  %v2069_v44 = vld [vmem:[%s4900_s5 + $0x178] sm:$0xff] }
 0x43c   :  { %2641 = vmatmul.mubr.msk.f32.vlgmr.msra.gmra.mrb[46].mxu1 %vm1348_vm0, %v1347_v16 }
 0x43d   :  { %2647 = vmatprep.mubr.msk.f32.mxu1 %vm1454_vm2, %v1450_v19 }
 0x507   :  { %v4448_v15 = vpop.f32.mrb[42].mxu1 }
 0x508   :  { %v4450_v21 = vpop.f32.mrb[43].mxu1 }
 0x50b   :  { %v4452_v24 = vpop.f32.mrb[44].mxu1 }
 0x50c   :  { %v4454_v20 = vpop.f32.mrb[45].mxu1 }
 0x50f   :  { %v2642_v1 = vpop.f32.mrb[46].mxu1 }
 0x510   :  { %v1628_v34 = vmul.f32 %v2642_v1, %v2642_v1  ;;  %v1618_v31 = vpop.f32.mrb[47].mxu1 }
 0x511   :  { %v1627_v35 = vmul.f32 %v1618_v31, %v1618_v31 }
 0x512   :  { %1633 = vrot.lane.b32.xlu1 %v1628_v34, %s3220_s30  ;;  %v2051_v34 = vld [vmem:[%s4900_s5 + $0xe8] sm:$0xff] }
 0x513   :  { %1631 = vrot.lane.b32.xlu0 %v1627_v35, %s3220_s30 }
 0x516   :  { %1891 = vperm.xlu1 %3122, %v3166_v36  }
 0x517   :  { %1887 = vperm.xlu0 %3121, %v3167_v37  }
 0x51a   :  { %3123 = vset.pattern.permute.xlu1 %v3223_v62 }
 0x51b   :  { %1895 = vperm.xlu0 %3121, %v3168_v54   ;;  %1935 = vperm.xlu1 %3123, %v3167_v37   ;;  %v2050_v37 = vld [vmem:[%s4900_s5 + $0xe0] sm:$0xff] }
 0x51f   :  { %1899 = vperm.xlu0 %3121, %v3169_v28   ;;  %1939 = vperm.xlu1 %3123, %v3166_v36   ;;  %v2046_v36 = vld [vmem:[%s4900_s5 + $0xc0] sm:$0xff] }
 0x523   :  { %1903 = vperm.xlu0 %3121, %v4159_v49   ;;  %1943 = vperm.xlu1 %3123, %v3168_v54   ;;  %v2979_v54 = vpack.c.bf16 %v2050_v37, %v2046_v36  ;;  %v2072_v37 = vld [vmem:[%s4900_s5 + $0x190] sm:$0xff] }
 0x527   :  { %1907 = vperm.xlu0 %3121, %v4167_v29   ;;  %1947 = vperm.xlu1 %3123, %v3169_v28   ;;  %v2040_v28 = vld [vmem:[%s4900_s5 + $0x90] sm:$0xff] }
 0x52b   :  { %1911 = vperm.xlu0 %3121, %v4186_v9   ;;  %1951 = vperm.xlu1 %3123, %v4159_v49  }
 0x52f   :  { %1915 = vperm.xlu0 %3121, %v4195_v0   ;;  %1955 = vperm.xlu1 %3123, %v4167_v29   ;;  %v1732_v29 = vld [vmem:[%s4899_s4] sm:$0xff] }
 0x530   :  { %v1734_v10 = vcombine.high %v1732_v29, %v1732_v29 }
 0x533   :  { %3124 = vset.pattern.permute.xlu0 %v3223_v62  ;;  %1959 = vperm.xlu1 %3123, %v4186_v9  }
 0x534   :  { %1963 = vperm.xlu0 %3124, %v4195_v0  }
 0x584   :  { %v1634_v53 = vpop.permute.xlu1 %1633 }
 0x585   :  { %v1638_v6 = vsub.f32 %v2642_v1, %v1634_v53  ;;  %v1632_v50 = vpop.permute.xlu0 %1631  ;;  %v2044_v53 = vld [vmem:[%s4900_s5 + $0xb0] sm:$0xff] }
 0x586   :  { %v1637_v16 = vsub.f32 %v1618_v31, %v1632_v50  ;;  %v2055_v50 = vld [vmem:[%s4900_s5 + $0x108] sm:$0xff] }
 0x587   :  { %v1640_v13 = vmax.f32 %v1638_v6, 0.0  ;;  %v4601_v6 = vpack.c.bf16 %v2044_v53, %v2040_v28  ;;  %v2081_v53 = vld [vmem:[%s4900_s5 + $0x1d8] sm:$0xff] }
 0x588   :  { %v1639_v38 = vmax.f32 %v1637_v16, 0.0  ;;  %v2059_v16 = vld [vmem:[%s4900_s5 + $0x128] sm:$0xff] }
 0x589   :  { %v1642_v52 = vadd.f32 1e-05, %v1640_v13  ;;  %v2049_v13 = vld [vmem:[%s4900_s5 + $0xd8] sm:$0xff] }
 0x58a   :  { %v1641_v8 = vadd.f32 1e-05, %v1639_v38  ;;  %v2981_v38 = vpack.c.bf16 %v2059_v16, %v2055_v50  ;;  %v2085_v50 = vld [vmem:[%s4900_s5 + $0x1f8] sm:$0xff] }
 0x58b   :  { %3130 = vrsqrt.f32 %v1642_v52  ;;  %v2053_v52 = vld [vmem:[%s4900_s5 + $0xf8] sm:$0xff]  ;;  %v4731_v16 = vpack.c.bf16 %v2085_v50, %v2081_v53 }
 0x58c   :  { %3132 = vrsqrt.f32 %v1641_v8  ;;  %v2054_v8 = vld [vmem:[%s4900_s5 + $0x100] sm:$0xff] }
 0x595   :  { %v3131_v49 = vpop.eup %3130 }
 0x596   :  { %v3133_v19 = vpop.eup %3132  ;;  %v1646_v9 = vsel %vm1337_vm1, %v2642_v1, %v3131_v49  ;;  %v2047_v1 = vld [vmem:[%s4900_s5 + $0xc8] sm:$0xff]  ;;  %v2058_v49 = vld [vmem:[%s4900_s5 + $0x120] sm:$0xff] }
 0x597   :  { %v1645_v0 = vsel %vm1337_vm1, %v1618_v31, %v3133_v19  ;;  %v2041_v31 = vld [vmem:[%s4900_s5 + $0x98] sm:$0xff]  ;;  %v2977_v35 = vpack.c.bf16 %v2051_v34, %v2047_v1  ;;  %v2983_v19 = vpack.c.bf16 %v2058_v49, %v2054_v8  ;;  %v1892_v8 = vpop.permute.xlu1 %1891 }
 0x598   :  { %v2961_v60 = vpack.c.bf16 %v1646_v9, %v1645_v0  ;;  %v4593_v62 = vpack.c.bf16 %v2045_v12, %v2041_v31  ;;  %v2048_v9 = vld [vmem:[%s4900_s5 + $0xd0] sm:$0xff]  ;;  %v2077_v34 = vld [vmem:[%s4900_s5 + $0x1b8] sm:$0xff]  ;;  %v2078_v31 = vld [vmem:[%s4900_s5 + $0x1c0] sm:$0xff] }
 0x599   :  { %v2052_v0 = vld [vmem:[%s4900_s5 + $0xf0] sm:$0xff] }
 0x59a   :  { %2962 = vmatprep.subr.bf16.mxu1 %v2961_v60 }
 0x59b   :  { %2964 = vmatpush3.bf16.msra.mxu1 %v2961_v60  ;;  %v4631_v60 = vpack.c.bf16 %v2052_v0, %v2048_v9 }
 0x59c   :  { %2377 = vmatprep.subr.msk.mxu1 %vm1760_vm3, %v1734_v10  ;;  %v2063_v10 = vld [vmem:[%s4900_s5 + $0x148] sm:$0xff] }
 0x59d   :  { %v2985_v39 = vpack.c.bf16 %v2067_v42, %v2063_v10  ;;  %v1936_v10 = vpop.permute.xlu1 %1935 }
 0x59e   :  { %2648 = vmatmul.mubr.msk.f32.vlgmr.msra.gmra.mrb[48].mxu1 %vm1454_vm2, %v4426_v4  ;;  %v2038_v4 = vld [vmem:[%s4900_s5 + $0x80] sm:$0xff] }
 0x59f   :  { %2650 = vmatprep.mubr.msk.f32.mxu1 %vm1454_vm2, %v4431_v11  ;;  %2378 = vmatpush1.msk.msra.mxu1 %vm1760_vm3, %v1732_v29  ;;  %v2042_v11 = vld [vmem:[%s4900_s5 + $0xa0] sm:$0xff]  ;;  %v4623_v29 = vpack.c.bf16 %v2053_v52, %v2049_v13  ;;  %v2080_v13 = vld [vmem:[%s4900_s5 + $0x1d0] sm:$0xff] }
 0x5a0   :  { %3029 = vmatprep.subr.bf16.mxu1 %v4533_v5 }
 0x5a1   :  { %v1940_v59 = vpop.permute.xlu1 %1939 }
 0x5a2   :  { %2651 = vmatmul.mubr.msk.f32.gmra.mrb[50].mxu1 %vm1454_vm2, %v4440_v23  ;;  %v4563_v23 = vpack.c.bf16 %v2037_v26, %v2033_v57  ;;  %v4683_v57 = vpack.c.bf16 %v2069_v44, %v2065_v41  ;;  %v2064_v26 = vld [vmem:[%s4900_s5 + $0x150] sm:$0xff] }
 0x5a3   :  { %1829 = vmatprep.mubr.f32.mxu1 %v3221_v2 }
 0x5a6   :  { %2379 = vmatmul.mubr.msk.f32.vlgmr.msra.gmra.mrb[52].mxu1 %vm1735_vm4, %v4450_v21  ;;  %v2032_v21 = vld [vmem:[%s4900_s5 + $0x50] sm:$0xff] }
 0x5a7   :  { %1835 = vmatprep.mubr.f32.mxu1 %v3221_v2  ;;  %3037 = vmatpush1.bf16.msra.mxu1 %v4541_v51 }
 0x5a8   :  { %3030 = vmatprep.subr.bf16.mxu1 %v4563_v23 }
 0x5aa   :  { %2380 = vmatmul.mubr.msk.f32.gmra.mrb[54].mxu1 %vm1735_vm4, %v4448_v15  ;;  %v2975_v15 = vpack.c.bf16 %v2042_v11, %v2038_v4  ;;  %v2068_v4 = vld [vmem:[%s4900_s5 + $0x170] sm:$0xff] }
 0x5ab   :  { %1841 = vmatprep.mubr.f32.mxu1 %v3221_v2  ;;  %v4691_v11 = vpack.c.bf16 %v2068_v4, %v2064_v26 }
 0x5ac   :  { %2976 = vmatpush1.bf16.msra.mxu0 %v2975_v15  ;;  %v2079_v15 = vld [vmem:[%s4900_s5 + $0x1c8] sm:$0xff] }
 0x5ad   :  { %2978 = vmatprep.subr.bf16.mxu0 %v2977_v35  ;;  %v2082_v35 = vld [vmem:[%s4900_s5 + $0x1e0] sm:$0xff] }
 0x5ae   :  { %2381 = vmatmul.mubr.msk.f32.gmra.mrb[56].mxu1 %vm1735_vm4, %v4454_v20  ;;  %v2995_v36 = vpack.c.bf16 %v2082_v35, %v2078_v31 }
 0x5af   :  { %1847 = vmatprep.mubr.f32.mxu1 %v3221_v2 }
 0x5b0   :  { %2980 = vmatpush1.bf16.msra.mxu0 %v2979_v54  ;;  %v2076_v54 = vld [vmem:[%s4900_s5 + $0x1b0] sm:$0xff] }
 0x5b1   :  { %2982 = vmatprep.subr.bf16.mxu0 %v2981_v38  ;;  %v4721_v28 = vpack.c.bf16 %v2076_v54, %v2072_v37  ;;  %v2084_v38 = vld [vmem:[%s4900_s5 + $0x1f0] sm:$0xff] }
 0x5b2   :  { %2382 = vmatmul.mubr.msk.f32.gmra.mrb[58].mxu1 %vm1735_vm4, %v4452_v24  ;;  %v2036_v24 = vld [vmem:[%s4900_s5 + $0x70] sm:$0xff]  ;;  %v4740_v52 = vpack.c.bf16 %v2084_v38, %v2080_v13 }
 0x5b3   :  { %1853 = vmatprep.mubr.f32.mxu1 %v3221_v2  ;;  %v4571_v20 = vpack.c.bf16 %v2036_v24, %v2032_v21  ;;  %v2083_v21 = vld [vmem:[%s4900_s5 + $0x1e8] sm:$0xff]  ;;  %v2073_v24 = vld [vmem:[%s4900_s5 + $0x198] sm:$0xff] }
 0x5b4   :  { %2984 = vmatpush1.bf16.msra.mxu0 %v2983_v19  ;;  %v2993_v1 = vpack.c.bf16 %v2083_v21, %v2079_v15  ;;  %v4713_v12 = vpack.c.bf16 %v2077_v34, %v2073_v24 }
 0x5b5   :  { %3038 = vmatpush1.bf16.msra.mxu1 %v4571_v20  ;;  %2986 = vmatprep.subr.bf16.mxu0 %v2985_v39 }
 0x5b6   :  { %3031 = vmatprep.subr.bf16.mxu1 %v4593_v62 }
 0x5b8   :  { %2988 = vmatpush1.bf16.msra.mxu0 %v2987_v32 }
 0x5b9   :  { %3039 = vmatpush1.bf16.msra.mxu1 %v4601_v6  ;;  %2990 = vmatprep.subr.bf16.mxu0 %v2989_v14 }
 0x5ba   :  { %3032 = vmatprep.subr.bf16.mxu1 %v4623_v29 }
 0x5bc   :  { %2992 = vmatpush1.bf16.msra.mxu0 %v2991_v63  ;;  %v1944_v63 = vpop.permute.xlu1 %1943 }
 0x5bd   :  { %3040 = vmatpush1.bf16.msra.mxu1 %v4631_v60  ;;  %2994 = vmatprep.subr.bf16.mxu0 %v2993_v1 }
 0x5be   :  { %3033 = vmatprep.subr.bf16.mxu1 %v4653_v56 }
 0x5c0   :  { %2996 = vmatpush1.bf16.msra.mxu0 %v2995_v36  ;;  %v1948_v36 = vpop.permute.xlu1 %1947 }
 0x5c1   :  { %3041 = vmatpush1.bf16.msra.mxu1 %v4661_v55  ;;  %2998 = vmatprep.subr.bf16.mxu0 %v4533_v5  ;;  %v1888_v5 = vpop.permute.xlu0 %1887 }
 0x5c2   :  { %3034 = vmatprep.subr.bf16.mxu1 %v4683_v57 }
 0x5c5   :  { %3042 = vmatpush1.bf16.msra.mxu1 %v4691_v11  ;;  %v1896_v33 = vpop.permute.xlu0 %1895 }
 0x5c6   :  { %3035 = vmatprep.subr.bf16.mxu1 %v4713_v12 }
 0x5c9   :  { %3043 = vmatpush1.bf16.msra.mxu1 %v4721_v28  ;;  %v1900_v15 = vpop.permute.xlu0 %1899 }
 0x5ca   :  { %3036 = vmatprep.subr.bf16.mxu1 %v4731_v16 }
 0x5cd   :  { %3044 = vmatpush1.bf16.msra.mxu1 %v4740_v52 }
 0x671   :  { %v2649_v49 = vpop.f32.mrb[48].mxu1 }
 0x672   :  { %v1713_v19 = vpop.f32.mrb[49].mxu1 }
 0x673   :  { %2383 = vmatmul.mubr.msk.f32.gmra.mrb[60].mxu1 %vm1735_vm4, %v1713_v19 }
 0x674   :  { %1859 = vmatprep.mubr.f32.mxu1 %v3221_v2 }
 0x675   :  { %v2652_v9 = vpop.f32.mrb[50].mxu1 }
 0x676   :  { %v1723_v0 = vpop.f32.mrb[51].mxu1 }
 0x677   :  { %2384 = vmatmul.mubr.msk.f32.gmra.mrb[62].mxu1 %vm1735_vm4, %v2649_v49 }
 0x678   :  { %1865 = vmatprep.mubr.f32.mxu1 %v3221_v2 }
 0x679   :  { %v1831_v42 = vpop.f32.mrb[52].mxu1 }
 0x67a   :  { %v1878_v46 = vsub.f32 %v4333_v58, %v1831_v42  ;;  %v1833_v39 = vpop.f32.mrb[53].mxu1 }
 0x67b   :  { %v1918_v48 = vmul.f32 %v1888_v5, %v1833_v39  ;;  %2385 = vmatmul.mubr.msk.f32.gmra.mrb[64].mxu1 %vm1735_vm4, %v1723_v0 }
 0x67c   :  { %1871 = vmatprep.mubr.f32.mxu1 %v3221_v2 }
 0x67d   :  { %v1837_v40 = vpop.f32.mrb[54].mxu1  ;;  %v1926_v32 = vmul.f32 %v1918_v48, %v1878_v46 }
 0x67e   :  { %v1879_v30 = vsub.f32 %v4341_v61, %v1837_v40  ;;  %v1839_v43 = vpop.f32.mrb[55].mxu1 }
 0x67f   :  { %v1966_v47 = vadd.f32 %v1936_v10, %v1926_v32  ;;  %v1919_v41 = vmul.f32 %v1892_v8, %v1839_v43  ;;  %2386 = vmatmul.mubr.msk.f32.gmra.mrb[66].mxu1 %vm1735_vm4, %v2652_v9 }
 0x680   :  { %2269 = vmatprep.mubr.f32.mxu1 %v3221_v2 }
 0x681   :  { %v2387_v58 = vmul.f32 -1.442695, %v1966_v47  ;;  %v1843_v14 = vpop.f32.mrb[56].mxu1  ;;  %v1927_v44 = vmul.f32 %v1919_v41, %v1879_v30 }
 0x682   :  { %v1880_v45 = vsub.f32 %v4351_v25, %v1843_v14  ;;  %v1845_v7 = vpop.f32.mrb[57].mxu1 }
 0x683   :  { %3134 = vpow2.f32 %v2387_v58  ;;  %v1967_v26 = vadd.f32 %v1940_v59, %v1927_v44  ;;  %v1920_v4 = vmul.f32 %v1896_v33, %v1845_v7 }
 0x685   :  { %v2388_v61 = vmul.f32 -1.442695, %v1967_v26  ;;  %v1849_v21 = vpop.f32.mrb[58].mxu1  ;;  %v1928_v24 = vmul.f32 %v1920_v4, %v1880_v45 }
 0x686   :  { %v1881_v1 = vsub.f32 %v4359_v27, %v1849_v21  ;;  %v1851_v34 = vpop.f32.mrb[59].mxu1 }
 0x687   :  { %3136 = vpow2.f32 %v2388_v61  ;;  %v1968_v31 = vadd.f32 %v1944_v63, %v1928_v24  ;;  %v1921_v35 = vmul.f32 %v1900_v15, %v1851_v34 }
 0x689   :  { %v2389_v37 = vmul.f32 -1.442695, %v1968_v31  ;;  %v1929_v54 = vmul.f32 %v1921_v35, %v1881_v1 }
 0x68b   :  { %3138 = vpow2.f32 %v2389_v37  ;;  %v1969_v25 = vadd.f32 %v1948_v36, %v1929_v54 }
 0x68d   :  { %v3135_v53 = vpop.eup %3134  ;;  %v2390_v50 = vmul.f32 -1.442695, %v1969_v25 }
 0x68e   :  { %v1998_v13 = vadd.f32 1.0, %v3135_v53 }
 0x68f   :  { %3140 = vpow2.f32 %v2390_v50 }
 0x690   :  { %3142 = vrcp.f32 %v1998_v13  ;;  %v3170_v13 = vld [vmem:[%s4895_s0 + $0x10] sm:$0xff] }
 0x691   :  { %v3137_v38 = vpop.eup %3136 }
 0x692   :  { %v1999_v8 = vadd.f32 1.0, %v3137_v38 }
 0x694   :  { %3144 = vrcp.f32 %v1999_v8 }
 0x695   :  { %v3139_v49 = vpop.eup %3138 }
 0x696   :  { %v2000_v19 = vadd.f32 1.0, %v3139_v49 }
 0x698   :  { %3146 = vrcp.f32 %v2000_v19  ;;  %v3171_v19 = vld [vmem:[%s4895_s0 + $0x18] sm:$0xff] }
 0x699   :  { %v3141_v27 = vpop.eup %3140 }
 0x69a   :  { %v4756_v9 = vpop.eup %3142  ;;  %v2001_v0 = vadd.f32 1.0, %v3141_v27 }
 0x69b   :  { %2151 = vmatmul.mubr.f32.vlgmr.msra.gmra.mrb[40].mxu0 %v4756_v9 }
 0x69c   :  { %3148 = vrcp.f32 %v2001_v0  ;;  %2156 = vmatprep.mubr.f32.mxu0 %v3221_v2  ;;  %3000 = vmatpush1.bf16.msra.mxu0 %v4541_v51 }
 0x69d   :  { %3002 = vmatprep.subr.bf16.mxu0 %v4563_v23  ;;  %v1904_v23 = vpop.permute.xlu0 %1903 }
 0x69e   :  { %v3145_v10 = vpop.eup %3144 }
 0x69f   :  { %2157 = vmatmul.mubr.f32.gmra.mrb[42].mxu0 %v3145_v10  ;;  %2270 = vmatmul.mubr.f32.vlgmr.msra.gmra.mrb[68].mxu1 %v3145_v10 }
 0x6a0   :  { %2162 = vmatprep.mubr.f32.mxu0 %v3221_v2  ;;  %2275 = vmatprep.mubr.f32.mxu1 %v3221_v2 }
 0x6a1   :  { %3004 = vmatpush1.bf16.msra.mxu0 %v4571_v20  ;;  %v1908_v20 = vpop.permute.xlu0 %1907 }
 0x6a2   :  { %v3147_v5 = vpop.eup %3146  ;;  %3006 = vmatprep.subr.bf16.mxu0 %v4593_v62 }
 0x6a3   :  { %2163 = vmatmul.mubr.f32.gmra.mrb[44].mxu0 %v3147_v5  ;;  %2276 = vmatmul.mubr.f32.gmra.mrb[70].mxu1 %v3147_v5 }
 0x6a4   :  { %2168 = vmatprep.mubr.f32.mxu0 %v3221_v2  ;;  %2281 = vmatprep.mubr.f32.mxu1 %v3221_v2 }
 0x6a5   :  { %3008 = vmatpush1.bf16.msra.mxu0 %v4601_v6  ;;  %v1952_v6 = vpop.permute.xlu1 %1951  ;;  %v1912_v42 = vpop.permute.xlu0 %1911 }
 0x6a6   :  { %v3149_v51 = vpop.eup %3148  ;;  %3010 = vmatprep.subr.bf16.mxu0 %v4623_v29 }
 0x6a7   :  { %2169 = vmatmul.mubr.f32.gmra.mrb[46].mxu0 %v3149_v51  ;;  %2282 = vmatmul.mubr.f32.gmra.mrb[72].mxu1 %v3149_v51 }
 0x6a8   :  { %2174 = vmatprep.mubr.f32.mxu0 %v3221_v2  ;;  %2287 = vmatprep.mubr.f32.mxu1 %v3221_v2 }
 0x6a9   :  { %3012 = vmatpush1.bf16.msra.mxu0 %v4631_v60  ;;  %v1956_v39 = vpop.permute.xlu1 %1955  ;;  %v1916_v30 = vpop.permute.xlu0 %1915 }
 0x6aa   :  { %3014 = vmatprep.subr.bf16.mxu0 %v4653_v56 }
 0x6ad   :  { %3016 = vmatpush1.bf16.msra.mxu0 %v4661_v55  ;;  %v1960_v41 = vpop.permute.xlu1 %1959  ;;  %v1964_v45 = vpop.permute.xlu0 %1963 }
 0x6ae   :  { %3018 = vmatprep.subr.bf16.mxu0 %v4683_v57 }
 0x6b1   :  { %3020 = vmatpush1.bf16.msra.mxu0 %v4691_v11 }
 0x6b2   :  { %3022 = vmatprep.subr.bf16.mxu0 %v4713_v12 }
 0x6b5   :  { %3024 = vmatpush1.bf16.msra.mxu0 %v4721_v28 }
 0x6b6   :  { %3026 = vmatprep.subr.bf16.mxu0 %v4731_v16 }
 0x6b9   :  { %3028 = vmatpush1.bf16.msra.mxu0 %v4740_v52 }
 0x746   :  { %v1855_v62 = vpop.f32.mrb[60].mxu1 }
 0x747   :  { %v1882_v29 = vsub.f32 %v4368_v17, %v1855_v62  ;;  %v1857_v60 = vpop.f32.mrb[61].mxu1 }
 0x748   :  { %v1922_v56 = vmul.f32 %v1904_v23, %v1857_v60  ;;  %v3172_v23 = vld [vmem:[%s4895_s0 + $0x20] sm:$0xff] }
 0x74a   :  { %v1930_v55 = vmul.f32 %v1922_v56, %v1882_v29  ;;  %v1861_v57 = vpop.f32.mrb[62].mxu1 }
 0x74b   :  { %v1883_v11 = vsub.f32 %v4373_v22, %v1861_v57  ;;  %v1863_v12 = vpop.f32.mrb[63].mxu1 }
 0x74c   :  { %v1970_v46 = vadd.f32 %v1952_v6, %v1930_v55  ;;  %v1923_v28 = vmul.f32 %v1908_v20, %v1863_v12 }
 0x74e   :  { %v2391_v16 = vmul.f32 -1.442695, %v1970_v46  ;;  %v1931_v48 = vmul.f32 %v1923_v28, %v1883_v11  ;;  %v1867_v52 = vpop.f32.mrb[64].mxu1 }
 0x74f   :  { %v1884_v59 = vsub.f32 %v4380_v3, %v1867_v52  ;;  %v1869_v40 = vpop.f32.mrb[65].mxu1 }
 0x750   :  { %3150 = vpow2.f32 %v2391_v16  ;;  %v1971_v32 = vadd.f32 %v1956_v39, %v1931_v48  ;;  %v1924_v17 = vmul.f32 %v1912_v42, %v1869_v40  ;;  %v3174_v42 = vld [vmem:[%s4895_s0 + $0x30] sm:$0xff] }
 0x752   :  { %v2392_v43 = vmul.f32 -1.442695, %v1971_v32  ;;  %v1932_v33 = vmul.f32 %v1924_v17, %v1884_v59  ;;  %v1873_v47 = vpop.f32.mrb[66].mxu1  ;;  %v3176_v59 = vld [vmem:[%s4895_s0 + $0x40] sm:$0xff] }
 0x753   :  { %v1885_v22 = vsub.f32 %v4387_v18, %v1873_v47  ;;  %v1875_v58 = vpop.f32.mrb[67].mxu1 }
 0x754   :  { %3152 = vpow2.f32 %v2392_v43  ;;  %v1972_v14 = vadd.f32 %v1960_v41, %v1932_v33  ;;  %v1925_v44 = vmul.f32 %v1916_v30, %v1875_v58  ;;  %v3177_v30 = vld [vmem:[%s4895_s0 + $0x48] sm:$0xff]  ;;  %v3178_v58 = vld [vmem:[%s4895_s0 + $0x50] sm:$0xff] }
 0x756   :  { %v2393_v7 = vmul.f32 -1.442695, %v1972_v14  ;;  %v1933_v63 = vmul.f32 %v1925_v44, %v1885_v22 }
 0x758   :  { %3154 = vpow2.f32 %v2393_v7  ;;  %v1973_v3 = vadd.f32 %v1964_v45, %v1933_v63  ;;  %v3179_v7 = vld [vmem:[%s4895_s0 + $0x58] sm:$0xff] }
 0x75a   :  { %v3151_v26 = vpop.eup %3150  ;;  %v2394_v4 = vmul.f32 -1.442695, %v1973_v3 }
 0x75b   :  { %v2002_v15 = vadd.f32 1.0, %v3151_v26 }
 0x75c   :  { %3156 = vpow2.f32 %v2394_v4 }
 0x75d   :  { %3158 = vrcp.f32 %v2002_v15 }
 0x75e   :  { %v3153_v61 = vpop.eup %3152 }
 0x75f   :  { %v2003_v21 = vadd.f32 1.0, %v3153_v61  ;;  %v3180_v61 = vld [vmem:[%s4895_s0 + $0x60] sm:$0xff] }
 0x761   :  { %3160 = vrcp.f32 %v2003_v21 }
 0x762   :  { %v3155_v24 = vpop.eup %3154 }
 0x763   :  { %v2004_v1 = vadd.f32 1.0, %v3155_v24 }
 0x765   :  { %3162 = vrcp.f32 %v2004_v1 }
 0x766   :  { %v3157_v18 = vpop.eup %3156 }
 0x767   :  { %v3159_v34 = vpop.eup %3158  ;;  %v2005_v31 = vadd.f32 1.0, %v3157_v18  ;;  %v3181_v18 = vld [vmem:[%s4895_s0 + $0x68] sm:$0xff] }
 0x768   :  { %2175 = vmatmul.mubr.f32.gmra.mrb[48].mxu0 %v3159_v34  ;;  %2288 = vmatmul.mubr.f32.gmra.mrb[74].mxu1 %v3159_v34 }
 0x769   :  { %3164 = vrcp.f32 %v2005_v31  ;;  %2180 = vmatprep.mubr.f32.mxu0 %v3221_v2  ;;  %2293 = vmatprep.mubr.f32.mxu1 %v3221_v2 }
 0x76b   :  { %v3161_v35 = vpop.eup %3160 }
 0x76c   :  { %2181 = vmatmul.mubr.f32.gmra.mrb[50].mxu0 %v3161_v35  ;;  %2294 = vmatmul.mubr.f32.gmra.mrb[76].mxu1 %v3161_v35 }
 0x76d   :  { %2186 = vmatprep.mubr.f32.mxu0 %v3221_v2  ;;  %2299 = vmatprep.mubr.f32.mxu1 %v3221_v2 }
 0x76e   :  { %v4789_v36 = vpop.f32.mrb[40].mxu0 }
 0x76f   :  { %v3163_v37 = vpop.eup %3162  ;;  %v4791_v54 = vpop.f32.mrb[41].mxu0 }
 0x770   :  { %2187 = vmatmul.mubr.f32.gmra.mrb[52].mxu0 %v3163_v37  ;;  %2300 = vmatmul.mubr.f32.gmra.mrb[78].mxu1 %v3163_v37 }
 0x771   :  { %2192 = vmatprep.mubr.f32.mxu0 %v3221_v2  ;;  %2305 = vmatprep.mubr.f32.mxu1 %v3221_v2 }
 0x772   :  { %v2158_v25 = vpop.f32.mrb[42].mxu0  ;;  %v2271_v53 = vpop.f32.mrb[68].mxu1 }
 0x773   :  { %v3165_v50 = vpop.eup %3164  ;;  %v2314_v38 = vmul.f32 %v3170_v13, %v2158_v25  ;;  %v2160_v8 = vpop.f32.mrb[43].mxu0 }
 0x774   :  { %v2273_v49 = vpop.f32.mrb[69].mxu1  ;;  %v2315_v27 = vmul.f32 %v3171_v19, %v2160_v8  ;;  %2193 = vmatmul.mubr.f32.gmra.mrb[54].mxu0 %v3165_v50  ;;  %2306 = vmatmul.mubr.f32.gmra.mrb[80].mxu1 %v3165_v50  ;;  %v3183_v8 = vld [vmem:[%s4895_s0 + $0x78] sm:$0xff]  ;;  %v3184_v19 = vld [vmem:[%s4895_s0] sm:$0xff] }
 0x775   :  { %v2330_v0 = vmul.f32 %v2314_v38, %v2271_v53  ;;  %2263 = vmatprep.mubr.f32.mxu0 %v3221_v2  ;;  %v3173_v2 = vld [vmem:[%s4895_s0 + $0x28] sm:$0xff]  ;;  %v3182_v53 = vld [vmem:[%s4895_s0 + $0x70] sm:$0xff] }
 0x776   :  { %v2331_v10 = vmul.f32 %v2315_v27, %v2273_v49  ;;  %v2164_v5 = vpop.f32.mrb[44].mxu0  ;;  %v2277_v51 = vpop.f32.mrb[70].mxu1  ;;  %v2312_v27 = vmul.f32 %v3184_v19, %v4789_v36 }
 0x777   :  { %2346 = vst [vmem:[%s4903_s8 + $0x10] sm:$0xff] %v2330_v0  ;;  %v2316_v20 = vmul.f32 %v3172_v23, %v2164_v5  ;;  %v2166_v62 = vpop.f32.mrb[45].mxu0  ;;  %v2279_v6 = vpop.f32.mrb[71].mxu1 }
 0x778   :  { %2347 = vst [vmem:[%s4903_s8 + $0x18] sm:$0xff] %v2331_v10  ;;  %v2317_v29 = vmul.f32 %v3173_v2, %v2166_v62  ;;  %2264 = vmatmul.mubr.f32.vlgmr.msra.gmra.mrb[56].mxu0 %v4756_v9  ;;  %v3175_v9 = vld [vmem:[%s4895_s0 + $0x38] sm:$0xff]  ;;  %v3185_v10 = vld [vmem:[%s4895_s0 + $0x8] sm:$0xff] }
 0x779   :  { %v2332_v60 = vmul.f32 %v2316_v20, %v2277_v51  ;;  %v2313_v5 = vmul.f32 %v3185_v10, %v4791_v54 }
 0x77a   :  { %v2333_v56 = vmul.f32 %v2317_v29, %v2279_v6  ;;  %v2170_v55 = vpop.f32.mrb[46].mxu0  ;;  %v2283_v57 = vpop.f32.mrb[72].mxu1 }
 0x77b   :  { %2348 = vst [vmem:[%s4903_s8 + $0x20] sm:$0xff] %v2332_v60  ;;  %v2318_v11 = vmul.f32 %v3174_v42, %v2170_v55  ;;  %v2172_v12 = vpop.f32.mrb[47].mxu0  ;;  %v2285_v46 = vpop.f32.mrb[73].mxu1 }
 0x77c   :  { %2349 = vst [vmem:[%s4903_s8 + $0x28] sm:$0xff] %v2333_v56  ;;  %v2319_v28 = vmul.f32 %v3175_v9, %v2172_v12 }
 0x77d   :  { %v2334_v39 = vmul.f32 %v2318_v11, %v2283_v57 }
 0x77e   :  { %v2335_v16 = vmul.f32 %v2319_v28, %v2285_v46 }
 0x77f   :  { %2350 = vst [vmem:[%s4903_s8 + $0x30] sm:$0xff] %v2334_v39 }
 0x780   :  { %2351 = vst [vmem:[%s4903_s8 + $0x38] sm:$0xff] %v2335_v16 }
 0x83b   :  { %v2176_v48 = vpop.f32.mrb[48].mxu0  ;;  %v2289_v52 = vpop.f32.mrb[74].mxu1 }
 0x83c   :  { %v2320_v40 = vmul.f32 %v3176_v59, %v2176_v48  ;;  %v2178_v32 = vpop.f32.mrb[49].mxu0  ;;  %v2291_v17 = vpop.f32.mrb[75].mxu1 }
 0x83d   :  { %v2321_v43 = vmul.f32 %v3177_v30, %v2178_v32 }
 0x83e   :  { %v2336_v33 = vmul.f32 %v2320_v40, %v2289_v52 }
 0x83f   :  { %v2337_v47 = vmul.f32 %v2321_v43, %v2291_v17  ;;  %v2182_v41 = vpop.f32.mrb[50].mxu0  ;;  %v2295_v22 = vpop.f32.mrb[76].mxu1 }
 0x840   :  { %2352 = vst [vmem:[%s4903_s8 + $0x40] sm:$0xff] %v2336_v33  ;;  %v2322_v14 = vmul.f32 %v3178_v58, %v2182_v41  ;;  %v2184_v44 = vpop.f32.mrb[51].mxu0  ;;  %v2297_v45 = vpop.f32.mrb[77].mxu1 }
 0x841   :  { %2353 = vst [vmem:[%s4903_s8 + $0x48] sm:$0xff] %v2337_v47  ;;  %v2323_v63 = vmul.f32 %v3179_v7, %v2184_v44 }
 0x842   :  { %v2338_v3 = vmul.f32 %v2322_v14, %v2295_v22 }
 0x843   :  { %v2339_v26 = vmul.f32 %v2323_v63, %v2297_v45  ;;  %v2188_v4 = vpop.f32.mrb[52].mxu0  ;;  %v2301_v15 = vpop.f32.mrb[78].mxu1 }
 0x844   :  { %2354 = vst [vmem:[%s4903_s8 + $0x50] sm:$0xff] %v2338_v3  ;;  %v2324_v21 = vmul.f32 %v3180_v61, %v2188_v4  ;;  %v2190_v24 = vpop.f32.mrb[53].mxu0  ;;  %v2303_v1 = vpop.f32.mrb[79].mxu1 }
 0x845   :  { %2355 = vst [vmem:[%s4903_s8 + $0x58] sm:$0xff] %v2339_v26  ;;  %v2325_v34 = vmul.f32 %v3181_v18, %v2190_v24 }
 0x846   :  { %v2340_v31 = vmul.f32 %v2324_v21, %v2301_v15 }
 0x847   :  { %v2341_v35 = vmul.f32 %v2325_v34, %v2303_v1  ;;  %v2194_v37 = vpop.f32.mrb[54].mxu0  ;;  %v2307_v25 = vpop.f32.mrb[80].mxu1 }
 0x848   :  { %2356 = vst [vmem:[%s4903_s8 + $0x60] sm:$0xff] %v2340_v31  ;;  %v2326_v50 = vmul.f32 %v3182_v53, %v2194_v37  ;;  %v2196_v13 = vpop.f32.mrb[55].mxu0  ;;  %v2309_v38 = vpop.f32.mrb[81].mxu1 }
 0x849   :  { %2357 = vst [vmem:[%s4903_s8 + $0x68] sm:$0xff] %v2341_v35  ;;  %v2327_v49 = vmul.f32 %v3183_v8, %v2196_v13 }
 0x84a   :  { %v2342_v0 = vmul.f32 %v2326_v50, %v2307_v25 }
 0x84b   :  { %v2343_v51 = vmul.f32 %v2327_v49, %v2309_v38  ;;  %v2265_v23 = vpop.f32.mrb[56].mxu0 }
 0x84c   :  { %2358 = vst [vmem:[%s4903_s8 + $0x70] sm:$0xff] %v2342_v0  ;;  %v2328_v20 = vmul.f32 %v2312_v27, %v2265_v23  ;;  %v2267_v62 = vpop.f32.mrb[57].mxu0 }
 0x84d   :  { %2359 = vst [vmem:[%s4903_s8 + $0x78] sm:$0xff] %v2343_v51  ;;  %v2329_v36 = vmul.f32 %v2313_v5, %v2267_v62 }
 0x84e   :  { %2344 = vst [vmem:[%s4903_s8] sm:$0xff] %v2328_v20 }
 0x84f   :  { %2345 = vst [vmem:[%s4903_s8 + $0x8] sm:$0xff] %v2329_v36 }
 0x850   :  { %2364 = vsyncpa [#allocation3], 1 }

</bundles_post_ra>
